<compile_context>
chip_gen: v7x
topology: tpu7x:2x2x1
jax: 0.10.0
libtpu: 0.0.40
codegen_flags: <defaults>
</compile_context>

<pallas_src>
import jax
import jax.numpy as jnp
import numpy as np
from jax.experimental import pallas as pl
from jax.experimental.pallas import tpu as pltpu

GNN_DEPTH = 3  # default gnn_depth


def _round_up(v, m):
    return (v + m - 1) // m * m


def _pick_edge_blocking(num_edges):
    """Padded edge count and the square tile used to stream the ExE operator."""
    ep = _round_up(num_edges, 128)
    if ep <= 512:
        return ep, ep  # small problem: one block, fully resident
    # v6e/v7x MXUs are 256x256: keep both the row tile and the contraction tile at 256.
    ep = _round_up(num_edges, 256)
    return ep, 256


def _vmem_limit_bytes():
    # Generation-aware limit: ~3/4 of physical VMEM (v5e/v6e 128 MiB -> 96, v7x 64 -> 48).
    try:
        cap = int(pltpu.get_tpu_info().vmem_capacity_bytes)
    except Exception:
        cap = 64 * 1024 * 1024
    return int(min(cap * 3 // 4, 100 * 1024 * 1024))


def gnn_dmpnn_kernel(feat_ref, w0_ref, b0_ref, w1_ref, b1_ref, m_ref, st_ref, bt_ref,
                     out_ref, e0_ref, ecur_ref, enxt_ref, acc_ref):
    """Grid = (depth, edge-row blocks, edge-k blocks); all axes sequential."""
    bf16 = jnp.bfloat16
    d, i, k = pl.program_id(0), pl.program_id(1), pl.program_id(2)
    nd, ni, nk = pl.num_programs(0), pl.num_programs(1), pl.num_programs(2)
    te = acc_ref.shape[0]
    tk = m_ref.shape[1]

    def dot(a, b):
        return jnp.dot(a, b, preferred_element_type=jnp.float32)

    def silu(v):
        # sigmoid reciprocal on the EUP (approx) -> keeps the divide off the f32 VALU path
        return v * pl.reciprocal(1.0 + jnp.exp(-v), approx=True)

    # ---- prologue (first grid step): edge_init over all edges ---------------------
    #      e0 = SiLU([x[row] || edge_attr] @ W0 + b0), W0 = stacked concat weight.
    @pl.when((d == 0) & (i == 0) & (k == 0))
    def _():
        e0 = silu(dot(feat_ref[...], w0_ref[...]) + b0_ref[...])      # [Ep, H] f32
        e0_ref[...] = e0
        ecur_ref[...] = e0.astype(bf16)

    # ---- depth step d, edge-row block i: msg = (M @ e_prev), streamed over k ------
    @pl.when(k == 0)
    def _():
        acc_ref[...] = jnp.zeros_like(acc_ref)

    e_blk = ecur_ref[pl.ds(pl.multiple_of(k * tk, tk), tk), :]        # [tk, H] bf16
    acc_ref[...] += dot(m_ref[...], e_blk)                            # [te, H] f32

    # ---- finalize row block: Linear (BN scale pre-folded) + ReLU + residual -------
    @pl.when(k == nk - 1)
    def _():
        z = dot(acc_ref[...].astype(bf16), w1_ref[...]) + b1_ref[...]
        z = jnp.maximum(z, 0.0)
        rows = pl.ds(pl.multiple_of(i * te, te), te)
        enxt_ref[rows, :] = (z + e0_ref[rows, :]).astype(bf16)        # store e in bf16

    # ---- end of depth step: publish new edge state for the next step --------------
    @pl.when((k == nk - 1) & (i == ni - 1) & (d < nd - 1))
    def _():
        ecur_ref[...] = enxt_ref[...]

    # ---- epilogue (last grid step): edge_to_node + SiLU + global_add_pool ---------
    @pl.when((k == nk - 1) & (i == ni - 1) & (d == nd - 1))
    def _():
        h = silu(enxt_ref[...].astype(jnp.float32)).astype(bf16)      # SiLU(e_final)
        node = silu(dot(st_ref[...], h)).astype(bf16)                 # scatter_add -> SiLU
        out_ref[...] = dot(bt_ref[...], node)                         # sum-pool per graph


def run_gnn(x, edge_attr, edge_index, batch, params, num_graphs):
    f32, bf16 = jnp.float32, jnp.bfloat16
    n_nodes, fn = x.shape
    n_edges, fe = edge_attr.shape
    h_dim = params["w1"].shape[0]
    row, col = edge_index[0], edge_index[1]

    ep, tek = _pick_edge_blocking(n_edges)
    te = tk = tek
    np_ = _round_up(n_nodes, 128)
    gp = _round_up(num_graphs, 8)
    hp = _round_up(h_dim, 128)
    fc = fn + fe
    fcp = _round_up(fc, 8)

    valid_e = (jnp.arange(ep) < n_edges).astype(f32)[:, None]
    valid_n = (jnp.arange(np_) < n_nodes).astype(f32)[:, None]

    row_p = jnp.zeros((ep,), jnp.int32).at[:n_edges].set(row)
    col_p = jnp.zeros((ep,), jnp.int32).at[:n_edges].set(col)
    bat_p = jnp.zeros((np_,), jnp.int32).at[:n_nodes].set(batch)

    # reverse-edge permutation derived from edge_index (no adjacent-pair assumption),
    # with an explicit check that every directed edge has its reverse present.
    rmatch = (row[None, :] == col[:, None]) & (col[None, :] == row[:, None])
    if not bool(jnp.all(jnp.any(rmatch, axis=1))):
        raise ValueError("DMPNN requires the reverse of every directed edge to be present.")
    rev = jnp.argmax(rmatch, axis=1)

    # structure operators (pad rows/cols masked to zero so padding never leaks):
    #   ST: [N,E] scatter_add(.,col)   BT: [G,N] global_add_pool
    #   M : [E,E] fused line-graph op, (M @ e)[j] = a_message[row[j]] - e[rev[j]]
    r_mat = jax.nn.one_hot(row_p, np_, dtype=f32) * valid_e
    c_mat = jax.nn.one_hot(col_p, np_, dtype=f32) * valid_e
    st = c_mat.T
    bt = (jax.nn.one_hot(bat_p, gp, dtype=f32) * valid_n).T
    p_mat = jnp.zeros((ep, ep), f32).at[:n_edges, :n_edges].set(
        jax.nn.one_hot(rev, n_edges, dtype=f32))
    m_op = r_mat @ st - p_mat                                          # entries in {0, 1}

    # x[row] gathered in the wrapper; the concat is folded into a single stacked W0.
    feat = jnp.concatenate([jnp.take(x, row, axis=0), edge_attr], axis=1)
    feat_p = jnp.zeros((ep, fcp), f32).at[:n_edges, :fc].set(feat)
    w0 = jnp.zeros((fcp, hp), f32).at[:fc, :h_dim].set(
        jnp.concatenate([params["w0a"], params["w0b"]], axis=0))
    b0 = jnp.zeros((1, hp), f32).at[0, :h_dim].set(params["b0"])

    # eval-mode BatchNorm folded into the conv Linear (scale into w1, shift into bias)
    g_eff = params["gamma"] / jnp.sqrt(params["running_var"] + 1e-5)
    w1_eff = params["w1"] * g_eff[None, :]
    b1_eff = params["b1"] * g_eff + params["beta"] - params["running_mean"] * g_eff
    w1 = jnp.zeros((hp, hp), f32).at[:h_dim, :h_dim].set(w1_eff)
    b1 = jnp.zeros((1, hp), f32).at[0, :h_dim].set(b1_eff)

    args = (
        feat_p.astype(bf16), w0.astype(bf16), b0,
        w1.astype(bf16), b1,
        m_op.astype(bf16), st.astype(bf16), bt.astype(bf16),
    )

    def full2d(shape):
        return pl.BlockSpec(shape, lambda d, i, k: (0, 0))

    grid = (GNN_DEPTH, ep // te, ep // tk)
    in_specs = [
        full2d(args[0].shape), full2d(args[1].shape), full2d(args[2].shape),
        full2d(args[3].shape), full2d(args[4].shape),
        # streamed ExE operator: only a (te, tk) tile is VMEM resident at a time,
        # double-buffered by the default BlockSpec pipeline.
        pl.BlockSpec((te, tk), lambda d, i, k: (i, k)),
        full2d(args[6].shape), full2d(args[7].shape),
    ]

    out = pl.pallas_call(
        gnn_dmpnn_kernel,
        out_shape=jax.ShapeDtypeStruct((gp, hp), f32),
        grid=grid,
        in_specs=in_specs,
        out_specs=full2d((gp, hp)),
        scratch_shapes=[
            pltpu.VMEM((ep, hp), f32),    # e0 (residual term, f32)
            pltpu.VMEM((ep, hp), bf16),   # e_cur: edge state read at depth d
            pltpu.VMEM((ep, hp), bf16),   # e_nxt: edge state written at depth d
            pltpu.VMEM((te, hp), f32),    # msg accumulator over k tiles
        ],
        compiler_params=pltpu.CompilerParams(
            dimension_semantics=("arbitrary", "arbitrary", "arbitrary"),
            vmem_limit_bytes=_vmem_limit_bytes(),
        ),
    )(*args)
    return out[:num_graphs, :h_dim]


def gnn_reference(x, edge_attr, edge_index, batch, params, num_graphs):
    """Pure-JAX f32 reference matching the PyTorch forward (eval mode)."""
    row, col = edge_index[0], edge_index[1]
    n_nodes = x.shape[0]
    w0 = jnp.concatenate([params["w0a"], params["w0b"]], axis=0)
    e0 = jax.nn.silu(jnp.concatenate([x[row], edge_attr], axis=1) @ w0 + params["b0"])
    rmatch = (row[None, :] == col[:, None]) & (col[None, :] == row[:, None])
    rev = jnp.argmax(rmatch, axis=1)
    g = params["gamma"] / jnp.sqrt(params["running_var"] + 1e-5)
    e = e0
    for _ in range(GNN_DEPTH):
        a_msg = jax.ops.segment_sum(e, col, num_segments=n_nodes)
        z = (a_msg[row] - e[rev]) @ params["w1"] + params["b1"]
        z = (z - params["running_mean"]) * g + params["beta"]
        e = jnp.maximum(z, 0.0) + e0
    h = jax.nn.silu(e)
    node = jax.nn.silu(jax.ops.segment_sum(h, col, num_segments=n_nodes))
    return jax.ops.segment_sum(node, batch, num_segments=num_graphs)


if __name__ == "__main__":
    # small, deterministic synthetic problem: two ring "molecules"
    n_graphs, nodes_per_graph = 2, 8
    n_nodes = n_graphs * nodes_per_graph
    fn, fe, h_dim = 16, 16, 128

    rows, cols = [], []
    for g in range(n_graphs):
        base = g * nodes_per_graph
        for i in range(nodes_per_graph):
            u, v = base + i, base + (i + 1) % nodes_per_graph
            rows += [u, v]
            cols += [v, u]
    edge_index = jnp.array([rows, cols], dtype=jnp.int32)       # [2, E]
    n_edges = edge_index.shape[1]
    batch = jnp.repeat(jnp.arange(n_graphs, dtype=jnp.int32), nodes_per_graph)

    key = jax.random.PRNGKey(0)
    ks = jax.random.split(key, 9)
    x = jax.random.normal(ks[0], (n_nodes, fn), jnp.float32)
    edge_attr = jax.random.normal(ks[1], (n_edges, fe), jnp.float32)

    params = dict(
        # edge_init: Linear(Fn + Fe -> H), stored as the two concat halves
        w0a=0.1 * jax.random.normal(ks[2], (fn, h_dim), jnp.float32),
        w0b=0.1 * jax.random.normal(ks[3], (fe, h_dim), jnp.float32),
        b0=0.1 * jax.random.normal(ks[4], (h_dim,), jnp.float32),
        # shared DMPNNConv mlp: Linear(H -> H) + BatchNorm1d(H) + ReLU
        w1=0.1 * jax.random.normal(ks[5], (h_dim, h_dim), jnp.float32),
        b1=0.1 * jax.random.normal(ks[6], (h_dim,), jnp.float32),
        gamma=1.0 + 0.1 * jax.random.normal(ks[7], (h_dim,), jnp.float32),
        beta=0.1 * jax.random.normal(ks[8], (h_dim,), jnp.float32),
        running_mean=jnp.zeros((h_dim,), jnp.float32),
        running_var=jnp.ones((h_dim,), jnp.float32),
    )

    out = jax.block_until_ready(run_gnn(x, edge_attr, edge_index, batch, params, n_graphs))
    assert out.shape == (n_graphs, h_dim) and out.dtype == jnp.float32

    ref = jax.block_until_ready(gnn_reference(x, edge_attr, edge_index, batch, params, n_graphs))
    np.testing.assert_allclose(np.asarray(out), np.asarray(ref), rtol=1e-1, atol=1e-1)
    print("KERNEL_OK")
</pallas_src>

<mosaic_0001>
module attributes {stable_mosaic.version = 11 : i64} {
  func.func @gnn_dmpnn_kernel(%arg0: i32, %arg1: i32, %arg2: i32, %arg3: memref<128x32xbf16, #tpu.memory_space<vmem>>, %arg4: memref<32x128xbf16, #tpu.memory_space<vmem>>, %arg5: memref<1x128xf32, #tpu.memory_space<vmem>>, %arg6: memref<128x128xbf16, #tpu.memory_space<vmem>>, %arg7: memref<1x128xf32, #tpu.memory_space<vmem>>, %arg8: memref<128x128xbf16, #tpu.memory_space<vmem>>, %arg9: memref<128x128xbf16, #tpu.memory_space<vmem>>, %arg10: memref<8x128xbf16, #tpu.memory_space<vmem>>, %arg11: memref<8x128xf32, #tpu.memory_space<vmem>>, %arg12: memref<128x128xf32, #tpu.memory_space<vmem>>, %arg13: memref<128x128xbf16, #tpu.memory_space<vmem>>, %arg14: memref<128x128xbf16, #tpu.memory_space<vmem>>, %arg15: memref<128x128xf32, #tpu.memory_space<vmem>>) attributes {dimension_semantics = [#tpu.dimension_semantics<arbitrary>, #tpu.dimension_semantics<arbitrary>, #tpu.dimension_semantics<arbitrary>], iteration_bounds = array<i64: 3, 1, 1>, scalar_prefetch = 0 : i64, scratch_operands = 4 : i64, tpu.core_type = #tpu.core_type<tc>, window_params = [{pipeline_mode = #tpu.pipeline_mode<synchronous>, transform_indices = @transform_0, window_bounds = array<i64: 128, 32>}, {pipeline_mode = #tpu.pipeline_mode<synchronous>, transform_indices = @transform_1, window_bounds = array<i64: 32, 128>}, {pipeline_mode = #tpu.pipeline_mode<synchronous>, transform_indices = @transform_2, window_bounds = array<i64: 1, 128>}, {pipeline_mode = #tpu.pipeline_mode<synchronous>, transform_indices = @transform_3, window_bounds = array<i64: 128, 128>}, {pipeline_mode = #tpu.pipeline_mode<synchronous>, transform_indices = @transform_4, window_bounds = array<i64: 1, 128>}, {transform_indices = @transform_5, window_bounds = array<i64: 128, 128>}, {pipeline_mode = #tpu.pipeline_mode<synchronous>, transform_indices = @transform_6, window_bounds = array<i64: 128, 128>}, {pipeline_mode = #tpu.pipeline_mode<synchronous>, transform_indices = @transform_7, window_bounds = array<i64: 8, 128>}, {pipeline_mode = #tpu.pipeline_mode<synchronous>, transform_indices = @transform_8, window_bounds = array<i64: 8, 128>}]} {
    %c0_i32 = arith.constant 0 : i32
    %0 = arith.cmpi eq, %arg0, %c0_i32 : i32
    %c0_i32_0 = arith.constant 0 : i32
    %1 = arith.cmpi eq, %arg1, %c0_i32_0 : i32
    %2 = arith.andi %0, %1 : i1
    %c0_i32_1 = arith.constant 0 : i32
    %3 = arith.cmpi eq, %arg2, %c0_i32_1 : i32
    %4 = arith.andi %2, %3 : i1
    %5 = arith.extui %4 : i1 to i32
    %c0_i32_2 = arith.constant 0 : i32
    %6 = arith.cmpi ne, %5, %c0_i32_2 : i32
    scf.if %6 {
      %c0_20 = arith.constant 0 : index
      %c0_21 = arith.constant 0 : index
      %36 = vector.load %arg3[%c0_20, %c0_21] : memref<128x32xbf16, #tpu.memory_space<vmem>>, vector<128x32xbf16>
      %c0_22 = arith.constant 0 : index
      %c0_23 = arith.constant 0 : index
      %37 = vector.load %arg4[%c0_22, %c0_23] : memref<32x128xbf16, #tpu.memory_space<vmem>>, vector<32x128xbf16>
      %cst_24 = arith.constant dense<0.000000e+00> : vector<128x128xf32>
      %38 = tpu.matmul %36, %37, %cst_24 {dimension_numbers = #tpu.dot_dimension_numbers<[1], [0], [0], [1], [0, 0, 1, 1], [], []>} : vector<128x32xbf16>, vector<32x128xbf16>, vector<128x128xf32> -> vector<128x128xf32>
      %c0_25 = arith.constant 0 : index
      %c0_26 = arith.constant 0 : index
      %39 = vector.load %arg5[%c0_25, %c0_26] : memref<1x128xf32, #tpu.memory_space<vmem>>, vector<1x128xf32>
      %40 = vector.broadcast %39 : vector<1x128xf32> to vector<128x128xf32>
      %41 = arith.addf %38, %40 : vector<128x128xf32>
      %cst_27 = arith.constant 0.000000e+00 : f32
      %42 = vector.broadcast %cst_27 : f32 to vector<128x128xf32>
      %43 = arith.subf %42, %41 : vector<128x128xf32>
      %44 = math.exp %43 : vector<128x128xf32>
      %cst_28 = arith.constant 1.000000e+00 : f32
      %45 = vector.broadcast %cst_28 : f32 to vector<128x128xf32>
      %46 = arith.addf %45, %44 : vector<128x128xf32>
      %47 = tpu.reciprocal %46 {approx = true} : vector<128x128xf32> -> vector<128x128xf32>
      %48 = arith.mulf %41, %47 : vector<128x128xf32>
      %c0_29 = arith.constant 0 : index
      %c0_30 = arith.constant 0 : index
      %49 = vector.load %arg12[%c0_29, %c0_30] : memref<128x128xf32, #tpu.memory_space<vmem>>, vector<128x128xf32>
      tpu.vector_store %arg12[%c0_29, %c0_30], %48 {strides = array<i32>} : memref<128x128xf32, #tpu.memory_space<vmem>>, vector<128x128xf32>,
      %50 = arith.truncf %48 : vector<128x128xf32> to vector<128x128xbf16>
      %c0_31 = arith.constant 0 : index
      %c0_32 = arith.constant 0 : index
      %51 = vector.load %arg13[%c0_31, %c0_32] : memref<128x128xbf16, #tpu.memory_space<vmem>>, vector<128x128xbf16>
      tpu.vector_store %arg13[%c0_31, %c0_32], %50 {strides = array<i32>} : memref<128x128xbf16, #tpu.memory_space<vmem>>, vector<128x128xbf16>,
    } else {
    }
    %c0_i32_3 = arith.constant 0 : i32
    %7 = arith.cmpi eq, %arg2, %c0_i32_3 : i32
    %8 = arith.extui %7 : i1 to i32
    %c0_i32_4 = arith.constant 0 : i32
    %9 = arith.cmpi ne, %8, %c0_i32_4 : i32
    scf.if %9 {
      %cst_20 = arith.constant 0.000000e+00 : f32
      %36 = vector.broadcast %cst_20 : f32 to vector<128x128xf32>
      %c0_21 = arith.constant 0 : index
      %c0_22 = arith.constant 0 : index
      %37 = vector.load %arg15[%c0_21, %c0_22] : memref<128x128xf32, #tpu.memory_space<vmem>>, vector<128x128xf32>
      tpu.vector_store %arg15[%c0_21, %c0_22], %36 {strides = array<i32>} : memref<128x128xf32, #tpu.memory_space<vmem>>, vector<128x128xf32>,
    } else {
    }
    %c128_i32 = arith.constant 128 : i32
    %10 = arith.muli %arg2, %c128_i32 : i32
    %11 = tpu.assume_multiple %10, 128 : i32
    %12 = arith.index_cast %11 : i32 to index
    %c0 = arith.constant 0 : index
    %13 = vector.load %arg13[%12, %c0] : memref<128x128xbf16, #tpu.memory_space<vmem>>, vector<128x128xbf16>
    %c0_5 = arith.constant 0 : index
    %c0_6 = arith.constant 0 : index
    %14 = vector.load %arg15[%c0_5, %c0_6] : memref<128x128xf32, #tpu.memory_space<vmem>>, vector<128x128xf32>
    %c0_7 = arith.constant 0 : index
    %c0_8 = arith.constant 0 : index
    %15 = vector.load %arg8[%c0_7, %c0_8] : memref<128x128xbf16, #tpu.memory_space<vmem>>, vector<128x128xbf16>
    %cst = arith.constant dense<0.000000e+00> : vector<128x128xf32>
    %16 = tpu.matmul %15, %13, %cst {dimension_numbers = #tpu.dot_dimension_numbers<[1], [0], [0], [1], [0, 0, 1, 1], [], []>} : vector<128x128xbf16>, vector<128x128xbf16>, vector<128x128xf32> -> vector<128x128xf32>
    %17 = arith.addf %14, %16 : vector<128x128xf32>
    %c0_9 = arith.constant 0 : index
    %c0_10 = arith.constant 0 : index
    %18 = vector.load %arg15[%c0_9, %c0_10] : memref<128x128xf32, #tpu.memory_space<vmem>>, vector<128x128xf32>
    tpu.vector_store %arg15[%c0_9, %c0_10], %17 {strides = array<i32>} : memref<128x128xf32, #tpu.memory_space<vmem>>, vector<128x128xf32>,
    %c0_i32_11 = arith.constant 0 : i32
    %19 = arith.cmpi eq, %arg2, %c0_i32_11 : i32
    %20 = arith.extui %19 : i1 to i32
    %c0_i32_12 = arith.constant 0 : i32
    %21 = arith.cmpi ne, %20, %c0_i32_12 : i32
    scf.if %21 {
      %c0_20 = arith.constant 0 : index
      %c0_21 = arith.constant 0 : index
      %36 = vector.load %arg15[%c0_20, %c0_21] : memref<128x128xf32, #tpu.memory_space<vmem>>, vector<128x128xf32>
      %37 = arith.truncf %36 : vector<128x128xf32> to vector<128x128xbf16>
      %c0_22 = arith.constant 0 : index
      %c0_23 = arith.constant 0 : index
      %38 = vector.load %arg6[%c0_22, %c0_23] : memref<128x128xbf16, #tpu.memory_space<vmem>>, vector<128x128xbf16>
      %cst_24 = arith.constant dense<0.000000e+00> : vector<128x128xf32>
      %39 = tpu.matmul %37, %38, %cst_24 {dimension_numbers = #tpu.dot_dimension_numbers<[1], [0], [0], [1], [0, 0, 1, 1], [], []>} : vector<128x128xbf16>, vector<128x128xbf16>, vector<128x128xf32> -> vector<128x128xf32>
      %c0_25 = arith.constant 0 : index
      %c0_26 = arith.constant 0 : index
      %40 = vector.load %arg7[%c0_25, %c0_26] : memref<1x128xf32, #tpu.memory_space<vmem>>, vector<1x128xf32>
      %41 = vector.broadcast %40 : vector<1x128xf32> to vector<128x128xf32>
      %42 = arith.addf %39, %41 : vector<128x128xf32>
      %cst_27 = arith.constant 0.000000e+00 : f32
      %43 = vector.broadcast %cst_27 : f32 to vector<128x128xf32>
      %44 = arith.maximumf %42, %43 : vector<128x128xf32>
      %c128_i32_28 = arith.constant 128 : i32
      %45 = arith.muli %arg1, %c128_i32_28 : i32
      %46 = tpu.assume_multiple %45, 128 : i32
      %47 = arith.index_cast %46 : i32 to index
      %c0_29 = arith.constant 0 : index
      %48 = vector.load %arg12[%47, %c0_29] : memref<128x128xf32, #tpu.memory_space<vmem>>, vector<128x128xf32>
      %49 = arith.addf %44, %48 : vector<128x128xf32>
      %50 = arith.truncf %49 : vector<128x128xf32> to vector<128x128xbf16>
      %51 = arith.index_cast %46 : i32 to index
      %c0_30 = arith.constant 0 : index
      %52 = vector.load %arg14[%51, %c0_30] : memref<128x128xbf16, #tpu.memory_space<vmem>>, vector<128x128xbf16>
      tpu.vector_store %arg14[%51, %c0_30], %50 {strides = array<i32>} : memref<128x128xbf16, #tpu.memory_space<vmem>>, vector<128x128xbf16>,
    } else {
    }
    %c0_i32_13 = arith.constant 0 : i32
    %22 = arith.cmpi eq, %arg2, %c0_i32_13 : i32
    %c0_i32_14 = arith.constant 0 : i32
    %23 = arith.cmpi eq, %arg1, %c0_i32_14 : i32
    %24 = arith.andi %22, %23 : i1
    %c2_i32 = arith.constant 2 : i32
    %25 = arith.cmpi slt, %arg0, %c2_i32 : i32
    %26 = arith.andi %24, %25 : i1
    %27 = arith.extui %26 : i1 to i32
    %c0_i32_15 = arith.constant 0 : i32
    %28 = arith.cmpi ne, %27, %c0_i32_15 : i32
    scf.if %28 {
      %c0_20 = arith.constant 0 : index
      %c0_21 = arith.constant 0 : index
      %36 = vector.load %arg14[%c0_20, %c0_21] : memref<128x128xbf16, #tpu.memory_space<vmem>>, vector<128x128xbf16>
      %c0_22 = arith.constant 0 : index
      %c0_23 = arith.constant 0 : index
      %37 = vector.load %arg13[%c0_22, %c0_23] : memref<128x128xbf16, #tpu.memory_space<vmem>>, vector<128x128xbf16>
      tpu.vector_store %arg13[%c0_22, %c0_23], %36 {strides = array<i32>} : memref<128x128xbf16, #tpu.memory_space<vmem>>, vector<128x128xbf16>,
    } else {
    }
    %c0_i32_16 = arith.constant 0 : i32
    %29 = arith.cmpi eq, %arg2, %c0_i32_16 : i32
    %c0_i32_17 = arith.constant 0 : i32
    %30 = arith.cmpi eq, %arg1, %c0_i32_17 : i32
    %31 = arith.andi %29, %30 : i1
    %c2_i32_18 = arith.constant 2 : i32
    %32 = arith.cmpi eq, %arg0, %c2_i32_18 : i32
    %33 = arith.andi %31, %32 : i1
    %34 = arith.extui %33 : i1 to i32
    %c0_i32_19 = arith.constant 0 : i32
    %35 = arith.cmpi ne, %34, %c0_i32_19 : i32
    scf.if %35 {
      %c0_20 = arith.constant 0 : index
      %c0_21 = arith.constant 0 : index
      %36 = vector.load %arg14[%c0_20, %c0_21] : memref<128x128xbf16, #tpu.memory_space<vmem>>, vector<128x128xbf16>
      %37 = arith.extf %36 : vector<128x128xbf16> to vector<128x128xf32>
      %cst_22 = arith.constant 0.000000e+00 : f32
      %38 = vector.broadcast %cst_22 : f32 to vector<128x128xf32>
      %39 = arith.subf %38, %37 : vector<128x128xf32>
      %40 = math.exp %39 : vector<128x128xf32>
      %cst_23 = arith.constant 1.000000e+00 : f32
      %41 = vector.broadcast %cst_23 : f32 to vector<128x128xf32>
      %42 = arith.addf %41, %40 : vector<128x128xf32>
      %43 = tpu.reciprocal %42 {approx = true} : vector<128x128xf32> -> vector<128x128xf32>
      %44 = arith.mulf %37, %43 : vector<128x128xf32>
      %45 = arith.truncf %44 : vector<128x128xf32> to vector<128x128xbf16>
      %c0_24 = arith.constant 0 : index
      %c0_25 = arith.constant 0 : index
      %46 = vector.load %arg9[%c0_24, %c0_25] : memref<128x128xbf16, #tpu.memory_space<vmem>>, vector<128x128xbf16>
      %cst_26 = arith.constant dense<0.000000e+00> : vector<128x128xf32>
      %47 = tpu.matmul %46, %45, %cst_26 {dimension_numbers = #tpu.dot_dimension_numbers<[1], [0], [0], [1], [0, 0, 1, 1], [], []>} : vector<128x128xbf16>, vector<128x128xbf16>, vector<128x128xf32> -> vector<128x128xf32>
      %cst_27 = arith.constant 0.000000e+00 : f32
      %48 = vector.broadcast %cst_27 : f32 to vector<128x128xf32>
      %49 = arith.subf %48, %47 : vector<128x128xf32>
      %50 = math.exp %49 : vector<128x128xf32>
      %cst_28 = arith.constant 1.000000e+00 : f32
      %51 = vector.broadcast %cst_28 : f32 to vector<128x128xf32>
      %52 = arith.addf %51, %50 : vector<128x128xf32>
      %53 = tpu.reciprocal %52 {approx = true} : vector<128x128xf32> -> vector<128x128xf32>
      %54 = arith.mulf %47, %53 : vector<128x128xf32>
      %55 = arith.truncf %54 : vector<128x128xf32> to vector<128x128xbf16>
      %c0_29 = arith.constant 0 : index
      %c0_30 = arith.constant 0 : index
      %56 = vector.load %arg10[%c0_29, %c0_30] : memref<8x128xbf16, #tpu.memory_space<vmem>>, vector<8x128xbf16>
      %cst_31 = arith.constant dense<0.000000e+00> : vector<8x128xf32>
      %57 = tpu.matmul %56, %55, %cst_31 {dimension_numbers = #tpu.dot_dimension_numbers<[1], [0], [0], [1], [0, 0, 1, 1], [], []>} : vector<8x128xbf16>, vector<128x128xbf16>, vector<8x128xf32> -> vector<8x128xf32>
      %c0_32 = arith.constant 0 : index
      %c0_33 = arith.constant 0 : index
      %58 = vector.load %arg11[%c0_32, %c0_33] : memref<8x128xf32, #tpu.memory_space<vmem>>, vector<8x128xf32>
      tpu.vector_store %arg11[%c0_32, %c0_33], %57 {strides = array<i32>} : memref<8x128xf32, #tpu.memory_space<vmem>>, vector<8x128xf32>,
    } else {
    }
    return
  }
  func.func @transform_0(%arg0: i32, %arg1: i32, %arg2: i32) -> (i32, i32) {
    %c0_i32 = arith.constant 0 : i32
    %c0_i32_0 = arith.constant 0 : i32
    %c0_i32_1 = arith.constant 0 : i32
    return %c0_i32, %c0_i32_0 : i32, i32
  }
  func.func @transform_1(%arg0: i32, %arg1: i32, %arg2: i32) -> (i32, i32) {
    %c0_i32 = arith.constant 0 : i32
    %c0_i32_0 = arith.constant 0 : i32
    %c0_i32_1 = arith.constant 0 : i32
    return %c0_i32, %c0_i32_0 : i32, i32
  }
  func.func @transform_2(%arg0: i32, %arg1: i32, %arg2: i32) -> (i32, i32) {
    %c0_i32 = arith.constant 0 : i32
    %c0_i32_0 = arith.constant 0 : i32
    %c0_i32_1 = arith.constant 0 : i32
    return %c0_i32, %c0_i32_0 : i32, i32
  }
  func.func @transform_3(%arg0: i32, %arg1: i32, %arg2: i32) -> (i32, i32) {
    %c0_i32 = arith.constant 0 : i32
    %c0_i32_0 = arith.constant 0 : i32
    %c0_i32_1 = arith.constant 0 : i32
    return %c0_i32, %c0_i32_0 : i32, i32
  }
  func.func @transform_4(%arg0: i32, %arg1: i32, %arg2: i32) -> (i32, i32) {
    %c0_i32 = arith.constant 0 : i32
    %c0_i32_0 = arith.constant 0 : i32
    %c0_i32_1 = arith.constant 0 : i32
    return %c0_i32, %c0_i32_0 : i32, i32
  }
  func.func @transform_5(%arg0: i32, %arg1: i32, %arg2: i32) -> (i32, i32) {
    %c0_i32 = arith.constant 0 : i32
    return %arg1, %arg2 : i32, i32
  }
  func.func @transform_6(%arg0: i32, %arg1: i32, %arg2: i32) -> (i32, i32) {
    %c0_i32 = arith.constant 0 : i32
    %c0_i32_0 = arith.constant 0 : i32
    %c0_i32_1 = arith.constant 0 : i32
    return %c0_i32, %c0_i32_0 : i32, i32
  }
  func.func @transform_7(%arg0: i32, %arg1: i32, %arg2: i32) -> (i32, i32) {
    %c0_i32 = arith.constant 0 : i32
    %c0_i32_0 = arith.constant 0 : i32
    %c0_i32_1 = arith.constant 0 : i32
    return %c0_i32, %c0_i32_0 : i32, i32
  }
  func.func @transform_8(%arg0: i32, %arg1: i32, %arg2: i32) -> (i32, i32) {
    %c0_i32 = arith.constant 0 : i32
    %c0_i32_0 = arith.constant 0 : i32
    %c0_i32_1 = arith.constant 0 : i32
    return %c0_i32, %c0_i32_0 : i32, i32
  }
}

</mosaic_0001>

<bundles_post_ra>
// kernel: tpu_custom_call.1
= control target key start
LH: loop header
LB: loop body
LE: loop exit
PB: predicated region body
PF: predicated region fallthrough
CT: control target
= control target key end

     0   :  { %13 = vsyncpa [#allocation7], 0  ;;  %s2921_s0 = inlined_call_operand.vmem [shape: bf16[128,32], index: 0, kind: input, shape index: {}]   ;;  %s2922_s1 = inlined_call_operand.vmem [shape: bf16[32,128], index: 1, kind: input, shape index: {}]   ;;  %s2923_s2 = inlined_call_operand.vmem [shape: f32[1,128], index: 2, kind: input, shape index: {}]   ;;  %s2924_s3 = inlined_call_operand.vmem [shape: bf16[128,128], index: 3, kind: input, shape index: {}]   ;;  %s2925_s4 = inlined_call_operand.vmem [shape: f32[1,128], index: 4, kind: input, shape index: {}]   ;;  %s2926_s5 = inlined_call_operand.hbm [shape: bf16[128,128], index: 5, kind: input, shape index: {}]   ;;  %s2927_s6 = inlined_call_operand.hbm [shape: bf16[128,128], index: 6, kind: input, shape index: {}]   ;;  %s2928_s7 = inlined_call_operand.vmem [shape: bf16[8,128], index: 7, kind: input, shape index: {}]   ;;  %s2929_s8 = inlined_call_operand.hbm [shape: f32[8,128], index: 8, kind: output, shape index: {}]  }
   0x1   :  { %14 = vsyncpa [#allocation10], 0 }
   0x2   :  { %15 = vsyncpa [#allocation8], 0  ;;  %s2441_s27 = smov 0   ;;  %s2443_s28 = smov 0  }
   0x3   :  { %s2445_s29 = smov 0  }
   0x4 LB: > { %s1719_s30 = sadd.s32 4294967295, %s2387_s29   ;;  %s40_s9 = sadd.s32 1, %s2383_s28  ;;  %s2387_s29 = sphi %s2445_s29, %s21_s29   ;;  %s2383_s28 = sphi %s2443_s28, %s2940_s28   ;;  %s2379_s27 = sphi %s2441_s27, %s2939_s27  }
   0x5   : > { %p42_p0 = scmp.ge.s32.totalorder %s40_s9, 3  ;;  %p1720_p1 = scmp.ge.s32.totalorder %s2387_s29, 1 }
   0x6   : > { %p241_p2 = scmp.lt.s32.totalorder %s2387_s29, 4  ;;  %p2468_p4 = scmp.eq.s32.totalorder %s1719_s30, 0 }
   0x7   : > { %s2942_s9 = smov (%p42_p0, %s40_s9), 0  ;;  %s2389_s12 = smov [#allocation6]  }
   0x8   : > { %p2462_p3 = pnand %p1720_p1, %p241_p2  ;;  %s272_s13 = sshll.u32 %s2389_s12, 4  ;;  %s273_s13 = int_to_ptr.vmem [resolvable:$true] %s272_s13 }
   0x9   : > { %s2934_s11 = scalar_select %p2468_p4, 1, 0 }
   0xa   : > { %s2933_s10 = scalar_select %p2462_p3, 1, 0 }
   0xb   : > { %p2001_p5 = pneg %p2462_p3  ;;  %s2390_s15 = smov [#allocation9]  }
   0xc   : > { %s285_s16 = sshll.u32 %s2390_s15, 4  ;;  %s2271_s19 = scalar_lea.hbm %s2926_s5, 1024  ;;  %s2480_s16 = int_to_ptr.vmem [resolvable:$true] %s285_s16 }
   0xd   : > { %p2476_p6 = pnand %p2468_p4, %p2001_p5  ;;  %p2272_p7 = scmp.ne.s32.totalorder %s2926_s5, %s2271_s19 }
   0xe   : > { %p2278_p11 = scmp.lt.u32.totalorder %s2271_s19, %s2926_s5 }
   0xf   : > { %p2273_p8 = pneg %p2476_p6 }
  0x11   : > { %p2274_p9 = pnand %p2273_p8, %p2272_p7 }
  0x13   : > { %p2275_p10 = pneg %p2274_p9 }
  0x15   : > { %p2280_p12 = pnand %p2278_p11, %p2275_p10 }
  0x17   : > { %2283 = shalt.err (!%p2280_p12)
}
  0x18   : > { %s2284_s24 = scalar_lea.vmem %s273_s13, 1024  ;;  %p2292_p2 = scmp.lt.s32.totalorder %s273_s13, %s273_s13 }
  0x19   : > { %p2285_p13 = scmp.ne.s32.totalorder %s273_s13, %s2284_s24  ;;  %p2293_p5 = scmp.lt.s32.totalorder %s2284_s24, %s2284_s24 }
  0x1b   : > { %p2287_p0 = pnand %p2285_p13, %p2273_p8  ;;  %p2294_p4 = por %p2293_p5, %p2292_p2 }
  0x1d   : > { %p2288_p1 = pneg %p2287_p0 }
  0x1f   : > { %p2295_p3 = pnand %p2294_p4, %p2288_p1 }
  0x21   : > { %2298 = shalt.err (!%p2295_p3)
}
  0x22   : > { %s2391_s25 = smov 64   ;;  %s2392_s26 = smov 4  }
  0x23   : > { %2004 = dma.hbm_to_vmem [thread:$0]  (!%p2476_p6), %s2926_s5, 1024, %s273_s13, [#allocation7], %s2391_s25, %s2391_s25, %s2392_s26  }
  0x24   : > { %s2299_s19 = scalar_lea.hbm %s2927_s6, 1024 }
  0x25   : > { %p2300_p7 = scmp.ne.s32.totalorder %s2927_s6, %s2299_s19  ;;  %p2306_p9 = scmp.lt.u32.totalorder %s2299_s19, %s2927_s6 }
  0x27   : > { %p2302_p3 = pnand %p2300_p7, %p2273_p8 }
  0x29   : > { %p2303_p4 = pneg %p2302_p3 }
  0x2b   : > { %p2308_p10 = pnand %p2306_p9, %p2303_p4 }
  0x2d   : > { %2311 = shalt.err (!%p2308_p10)
}
  0x2e   : > { %s2312_s13 = scalar_lea.vmem %s2480_s16, 1024  ;;  %p2320_p0 = scmp.lt.s32.totalorder %s2480_s16, %s2480_s16 }
  0x2f   : > { %p2313_p11 = scmp.ne.s32.totalorder %s2480_s16, %s2312_s13  ;;  %p2321_p1 = scmp.lt.s32.totalorder %s2312_s13, %s2312_s13 }
  0x31   : > { %p2315_p12 = pnand %p2313_p11, %p2273_p8  ;;  %p2322_p2 = por %p2321_p1, %p2320_p0 }
  0x33   : > { %p2316_p13 = pneg %p2315_p12 }
  0x35   : > { %p2323_p5 = pnand %p2322_p2, %p2316_p13 }
  0x37   : > { %2326 = shalt.err (!%p2323_p5)
}
  0x38   : > { %2007 = dma.hbm_to_vmem [thread:$0]  (!%p2476_p6), %s2927_s6, 1024, %s2480_s16, [#allocation10], %s2391_s25, %s2391_s25, %s2392_s26  }
  0x39   : > { %p2936_p7 = scmp.ne.s32.totalorder %s2933_s10, 0 }
  0x3a   : > { %p2937_p3 = scmp.ne.s32.totalorder (!%p2936_p7), %s2934_s11, 0 }
  0x3b   : > { %304 = sbr.rel (%p2936_p7) target bundleno = 1449 (0x5a9), region = 52 }
  0x42   : > { %2366 = dma.done.wait (%p2937_p3), [#allocation7], 1024  }
  0x43   : > { %2368 = vsyncadd (%p2937_p3), [#allocation7], 4294966272 }
  0x44   : > { %2370 = dma.done.wait (%p2937_p3), [#allocation10], 1024  }
  0x45   : > { %2372 = vsyncadd (%p2937_p3), [#allocation10], 4294966272  ;;  %p334_p8 = scmp.eq.s32.totalorder %s2379_s27, 0 }
  0x46   : > { %v2045_v0 = vld [vmem:[%s2922_s1] sm:$0xff] (%p334_p8)   ;;  %v2046_v1 = vld [vmem:[%s2922_s1 + $0x8] sm:$0xff] (%p334_p8)   ;;  %vm422_vm0 = vcmask (%p334_p8), 261120   ;;  %v2051_v6 = vld [vmem:[%s2921_s0 + $0x10] sm:$0xff] (%p334_p8)  }
  0x47   : > { %342 = sbr.rel (!%p334_p8) target bundleno = 354 (0x162), region = 64  ;;  %1849 = vmatprep.subr.bf16.mxu0 (%p334_p8), %v2045_v0  ;;  %1985 = vmatprep.subr.bf16.mxu1 (%p334_p8), %v2045_v0  ;;  %v2047_v2 = vld [vmem:[%s2921_s0] sm:$0xff] (%p334_p8)   ;;  %v2049_v4 = vld [vmem:[%s2921_s0 + $0x8] sm:$0xff] (%p334_p8)   ;;  %v2052_v7 = vld [vmem:[%s2921_s0 + $0x30] sm:$0xff] (%p334_p8)  }
  0x48   : > { %1850 = vmatpush3.bf16.msra.mxu0 (%p334_p8), %v2045_v0  ;;  %1987 = vmatpush3.bf16.msra.mxu1 (%p334_p8), %v2045_v0  ;;  %v2048_v3 = vld [vmem:[%s2921_s0 + $0x20] sm:$0xff] (%p334_p8)   ;;  %v2050_v5 = vld [vmem:[%s2921_s0 + $0x28] sm:$0xff] (%p334_p8)   ;;  %v2053_v8 = vld [vmem:[%s2921_s0 + $0x18] sm:$0xff] (%p334_p8)  }
  0x49   : > { %1851 = vmatprep.subr.bf16.mxu0 (%p334_p8), %v2046_v1  ;;  %1986 = vmatprep.subr.bf16.mxu1 (%p334_p8), %v2046_v1  ;;  %v2054_v9 = vld [vmem:[%s2921_s0 + $0x38] sm:$0xff] (%p334_p8)   ;;  %v2581_v10 = vld [vmem:[%s2923_s2] ss:$0 sm:$0xff] (%p334_p8) }
  0x4a   : > { %1853 = vmatprep.mubr.msk.bf16.mxu0 (%p334_p8), %vm422_vm0, %v2047_v2  ;;  %1861 = vmatprep.mubr.msk.bf16.mxu1 (%p334_p8), %vm422_vm0, %v2048_v3 }
  0x4c   : > { %1852 = vmatpush3.bf16.msra.mxu0 (%p334_p8), %v2046_v1  ;;  %1988 = vmatpush3.bf16.msra.mxu1 (%p334_p8), %v2046_v1 }
  0x4f   : > { %1854 = vmatmul.mubr.msk.bf16.vlgmr.msra.gmra.mrb[0].mxu0 %vm422_vm0, %v2049_v4  ;;  %1862 = vmatmul.mubr.msk.bf16.vlgmr.msra.gmra.mrb[0].mxu1 %vm422_vm0, %v2050_v5 }
  0x50   : > { %1857 = vmatprep.mubr.msk.bf16.mxu0 %vm422_vm0, %v2051_v6  ;;  %1865 = vmatprep.mubr.msk.bf16.mxu1 %vm422_vm0, %v2052_v7 }
  0x57   : > { %1858 = vmatmul.mubr.msk.bf16.gmra.mrb[4].mxu0 %vm422_vm0, %v2053_v8  ;;  %1866 = vmatmul.mubr.msk.bf16.gmra.mrb[4].mxu1 %vm422_vm0, %v2054_v9 }
 0x122   : > { %v1855_v11 = vpop.f32.mrb[0].mxu0  ;;  %v1863_v12 = vpop.f32.mrb[0].mxu1 }
 0x123   : > { %v2584_v13 = vadd.f32 %v1855_v11, %v2581_v10  ;;  %v2587_v14 = vadd.f32 %v1863_v12, %v2581_v10  ;;  %v481_v15 = vpop.f32.mrb[1].mxu0  ;;  %v513_v16 = vpop.f32.mrb[1].mxu1 }
 0x124   : > { %v2590_v17 = vadd.f32 %v2581_v10, %v481_v15  ;;  %v2593_v18 = vadd.f32 %v2581_v10, %v513_v16  ;;  %v1856_v19 = vpop.f32.mrb[2].mxu0  ;;  %v1864_v20 = vpop.f32.mrb[2].mxu1 }
 0x125   : > { %v546_v21 = vsub.f32 0.0, %v2584_v13  ;;  %v554_v22 = vsub.f32 0.0, %v2587_v14  ;;  %v2598_v23 = vadd.f32 %v1856_v19, %v2581_v10  ;;  %v2601_v24 = vadd.f32 %v1864_v20, %v2581_v10  ;;  %v484_v25 = vpop.f32.mrb[3].mxu0  ;;  %v516_v26 = vpop.f32.mrb[3].mxu1 }
 0x126   : > { %v544_v27 = vsub.f32 0.0, %v2590_v17  ;;  %v552_v28 = vsub.f32 0.0, %v2593_v18  ;;  %v2606_v29 = vadd.f32 %v2581_v10, %v484_v25  ;;  %v2609_v30 = vadd.f32 %v2581_v10, %v516_v26 }
 0x127   : > { %v564_v31 = vmul.f32 1.442695, %v546_v21  ;;  %v580_v32 = vmul.f32 1.442695, %v554_v22  ;;  %v547_v33 = vsub.f32 0.0, %v2598_v23  ;;  %v555_v34 = vsub.f32 0.0, %v2601_v24 }
 0x128   : > { %v560_v35 = vmul.f32 1.442695, %v544_v27  ;;  %v576_v36 = vmul.f32 1.442695, %v552_v28  ;;  %v545_v37 = vsub.f32 0.0, %v2606_v29  ;;  %v553_v38 = vsub.f32 0.0, %v2609_v30 }
 0x129   : > { %2055 = vpow2.f32 %v564_v31  ;;  %v566_v39 = vmul.f32 1.442695, %v547_v33  ;;  %v582_v40 = vmul.f32 1.442695, %v555_v34 }
 0x12a   : > { %2057 = vpow2.f32 %v580_v32  ;;  %v1859_v41 = vpop.f32.mrb[4].mxu0  ;;  %v1867_v42 = vpop.f32.mrb[4].mxu1  ;;  %v562_v43 = vmul.f32 1.442695, %v545_v37  ;;  %v578_v48 = vmul.f32 1.442695, %v553_v38 }
 0x12b   : > { %2059 = vpow2.f32 %v560_v35  ;;  %v2616_v44 = vadd.f32 %v1859_v41, %v2581_v10  ;;  %v2619_v45 = vadd.f32 %v1867_v42, %v2581_v10  ;;  %v497_v46 = vpop.f32.mrb[5].mxu0  ;;  %v529_v47 = vpop.f32.mrb[5].mxu1 }
 0x12c   : > { %2061 = vpow2.f32 %v576_v36  ;;  %v2622_v49 = vadd.f32 %v2581_v10, %v497_v46  ;;  %v2625_v50 = vadd.f32 %v2581_v10, %v529_v47  ;;  %v1860_v51 = vpop.f32.mrb[6].mxu0  ;;  %v1868_v52 = vpop.f32.mrb[6].mxu1 }
 0x12d   : > { %2063 = vpow2.f32 %v566_v39  ;;  %v550_v53 = vsub.f32 0.0, %v2616_v44  ;;  %v558_v54 = vsub.f32 0.0, %v2619_v45  ;;  %v2630_v55 = vadd.f32 %v1860_v51, %v2581_v10  ;;  %v500_v56 = vpop.f32.mrb[7].mxu0  ;;  %v532_v57 = vpop.f32.mrb[7].mxu1 }
 0x12e   : > { %2065 = vpow2.f32 %v582_v40  ;;  %v548_v58 = vsub.f32 0.0, %v2622_v49  ;;  %v556_v59 = vsub.f32 0.0, %v2625_v50  ;;  %v2636_v12 = vadd.f32 %v1868_v52, %v2581_v10 }
 0x12f   : > { %2067 = vpow2.f32 %v562_v43  ;;  %v572_v60 = vmul.f32 1.442695, %v550_v53  ;;  %v588_v61 = vmul.f32 1.442695, %v558_v54  ;;  %v551_v62 = vsub.f32 0.0, %v2630_v55 }
 0x130   : > { %2069 = vpow2.f32 %v578_v48  ;;  %v568_v63 = vmul.f32 1.442695, %v548_v58  ;;  %v584_v0 = vmul.f32 1.442695, %v556_v59  ;;  %v2639_v19 = vadd.f32 %v2581_v10, %v500_v56 }
 0x131   : > { %2071 = vpow2.f32 %v572_v60  ;;  %v574_v1 = vmul.f32 1.442695, %v551_v62  ;;  %v2642_v22 = vadd.f32 %v2581_v10, %v532_v57  ;;  %v559_v31 = vsub.f32 0.0, %v2636_v12 }
 0x132   : > { %2073 = vpow2.f32 %v588_v61  ;;  %v549_v34 = vsub.f32 0.0, %v2639_v19 }
 0x133   : > { %v2056_v2 = vpop.eup %2055  ;;  %2075 = vpow2.f32 %v568_v63  ;;  %v557_v37 = vsub.f32 0.0, %v2642_v22  ;;  %v590_v41 = vmul.f32 1.442695, %v559_v31 }
 0x134   : > { %v2058_v3 = vpop.eup %2057  ;;  %v594_v4 = vadd.f32 1.0, %v2056_v2  ;;  %2077 = vpow2.f32 %v584_v0  ;;  %v570_v46 = vmul.f32 1.442695, %v549_v34 }
 0x135   : > { %v2060_v5 = vpop.eup %2059  ;;  %v602_v6 = vadd.f32 1.0, %v2058_v3  ;;  %2079 = vpow2.f32 %v574_v1  ;;  %v586_v51 = vmul.f32 1.442695, %v557_v37 }
 0x136   : > { %v2062_v7 = vpop.eup %2061  ;;  %2081 = vrcp.f32 %v594_v4  ;;  %v592_v8 = vadd.f32 1.0, %v2060_v5 }
 0x137   : > { %v2064_v9 = vpop.eup %2063  ;;  %2083 = vrcp.f32 %v602_v6  ;;  %v600_v11 = vadd.f32 1.0, %v2062_v7 }
 0x138   : > { %v2066_v15 = vpop.eup %2065  ;;  %2085 = vrcp.f32 %v592_v8  ;;  %v595_v16 = vadd.f32 1.0, %v2064_v9 }
 0x139   : > { %v2068_v20 = vpop.eup %2067  ;;  %2087 = vrcp.f32 %v600_v11  ;;  %v603_v21 = vadd.f32 1.0, %v2066_v15 }
 0x13a   : > { %v2070_v25 = vpop.eup %2069  ;;  %2089 = vrcp.f32 %v595_v16  ;;  %v593_v26 = vadd.f32 1.0, %v2068_v20 }
 0x13b   : > { %v2072_v27 = vpop.eup %2071  ;;  %2091 = vrcp.f32 %v603_v21  ;;  %v601_v28 = vadd.f32 1.0, %v2070_v25 }
 0x13c   : > { %v2074_v32 = vpop.eup %2073  ;;  %2093 = vrcp.f32 %v593_v26  ;;  %v598_v33 = vadd.f32 1.0, %v2072_v27 }
 0x13d   : > { %v2076_v35 = vpop.eup %2075  ;;  %2095 = vrcp.f32 %v601_v28  ;;  %v606_v36 = vadd.f32 1.0, %v2074_v32 }
 0x13e   : > { %v2078_v10 = vpop.eup %2077  ;;  %2097 = vrcp.f32 %v598_v33  ;;  %v596_v38 = vadd.f32 1.0, %v2076_v35 }
 0x13f   : > { %v2080_v39 = vpop.eup %2079  ;;  %2099 = vrcp.f32 %v606_v36  ;;  %v604_v40 = vadd.f32 1.0, %v2078_v10 }
 0x140   : > { %v2082_v42 = vpop.eup %2081  ;;  %2101 = vrcp.f32 %v596_v38  ;;  %v599_v43 = vadd.f32 1.0, %v2080_v39 }
 0x141   : > { %v2084_v47 = vpop.eup %2083  ;;  %v626_v48 = vmul.f32 %v2082_v42, %v2584_v13  ;;  %2103 = vrcp.f32 %v604_v40 }
 0x142   : > { %v2086_v52 = vpop.eup %2085  ;;  %v634_v53 = vmul.f32 %v2084_v47, %v2587_v14  ;;  %2105 = vrcp.f32 %v599_v43 }
 0x143   : > { %v2088_v54 = vpop.eup %2087  ;;  %642 = vst [vmem:[#allocation2 + $0x10] sm:$0xff] %v626_v48  ;;  %v624_v56 = vmul.f32 %v2086_v52, %v2590_v17  ;;  %2107 = vpow2.f32 %v590_v41 }
 0x144   : > { %v2090_v57 = vpop.eup %2089  ;;  %650 = vst [vmem:[#allocation2 + $0x50] sm:$0xff] %v634_v53  ;;  %v632_v58 = vmul.f32 %v2088_v54, %v2593_v18  ;;  %2109 = vpow2.f32 %v570_v46 }
 0x145   : > { %v2092_v59 = vpop.eup %2091  ;;  %640 = vst [vmem:[#allocation2] sm:$0xff] %v624_v56  ;;  %v627_v13 = vmul.f32 %v2090_v57, %v2598_v23  ;;  %2111 = vpow2.f32 %v586_v51 }
 0x146   : > { %v2094_v60 = vpop.eup %2093  ;;  %648 = vst [vmem:[#allocation2 + $0x40] sm:$0xff] %v632_v58  ;;  %v635_v14 = vmul.f32 %v2092_v59, %v2601_v24 }
 0x147   : > { %v2096_v61 = vpop.eup %2095  ;;  %643 = vst [vmem:[#allocation2 + $0x18] sm:$0xff] %v627_v13  ;;  %v657_v62 = vpack.c.bf16 %v627_v13, %v626_v48  ;;  %v625_v17 = vmul.f32 %v2094_v60, %v2606_v29 }
 0x148   : > { %v2098_v63 = vpop.eup %2097  ;;  %651 = vst [vmem:[#allocation2 + $0x58] sm:$0xff] %v635_v14  ;;  %v661_v0 = vpack.c.bf16 %v635_v14, %v634_v53  ;;  %v633_v18 = vmul.f32 %v2096_v61, %v2609_v30 }
 0x149   : > { %v2100_v1 = vpop.eup %2099  ;;  %665 = vst [vmem:[#allocation3 + $0x8] sm:$0xff] %v657_v62  ;;  %641 = vst [vmem:[#allocation2 + $0x8] sm:$0xff] %v625_v17  ;;  %v656_v2 = vpack.c.bf16 %v625_v17, %v624_v56  ;;  %v630_v23 = vmul.f32 %v2098_v63, %v2616_v44 }
 0x14a   : > { %v2102_v3 = vpop.eup %2101  ;;  %669 = vst [vmem:[#allocation3 + $0x28] sm:$0xff] %v661_v0  ;;  %649 = vst [vmem:[#allocation2 + $0x48] sm:$0xff] %v633_v18  ;;  %v660_v24 = vpack.c.bf16 %v633_v18, %v632_v58  ;;  %v638_v4 = vmul.f32 %v2100_v1, %v2619_v45 }
 0x14b   : > { %v2104_v5 = vpop.eup %2103  ;;  %664 = vst [vmem:[#allocation3] sm:$0xff] %v656_v2  ;;  %646 = vst [vmem:[#allocation2 + $0x30] sm:$0xff] %v630_v23  ;;  %v628_v29 = vmul.f32 %v2102_v3, %v2622_v49 }
 0x14c   : > { %v2106_v6 = vpop.eup %2105  ;;  %668 = vst [vmem:[#allocation3 + $0x20] sm:$0xff] %v660_v24  ;;  %654 = vst [vmem:[#allocation2 + $0x70] sm:$0xff] %v638_v4  ;;  %v636_v30 = vmul.f32 %v2104_v5, %v2625_v50 }
 0x14d   : > { %v2108_v7 = vpop.eup %2107  ;;  %644 = vst [vmem:[#allocation2 + $0x20] sm:$0xff] %v628_v29  ;;  %v631_v44 = vmul.f32 %v2106_v6, %v2630_v55 }
 0x14e   : > { %v2110_v8 = vpop.eup %2109  ;;  %652 = vst [vmem:[#allocation2 + $0x60] sm:$0xff] %v636_v30  ;;  %v607_v9 = vadd.f32 1.0, %v2108_v7 }
 0x14f   : > { %v2112_v11 = vpop.eup %2111  ;;  %647 = vst [vmem:[#allocation2 + $0x38] sm:$0xff] %v631_v44  ;;  %v659_v45 = vpack.c.bf16 %v631_v44, %v630_v23  ;;  %v597_v15 = vadd.f32 1.0, %v2110_v8 }
 0x150   : > { %2113 = vrcp.f32 %v607_v9  ;;  %v605_v16 = vadd.f32 1.0, %v2112_v11 }
 0x151   : > { %667 = vst [vmem:[#allocation3 + $0x18] sm:$0xff] %v659_v45  ;;  %2115 = vrcp.f32 %v597_v15 }
 0x152   : > { %2117 = vrcp.f32 %v605_v16 }
 0x15a   : > { %v2114_v49 = vpop.eup %2113 }
 0x15b   : > { %v2116_v20 = vpop.eup %2115  ;;  %v639_v50 = vmul.f32 %v2114_v49, %v2636_v12 }
 0x15c   : > { %v2118_v21 = vpop.eup %2117  ;;  %v629_v25 = vmul.f32 %v2116_v20, %v2639_v19 }
 0x15d   : > { %655 = vst [vmem:[#allocation2 + $0x78] sm:$0xff] %v639_v50  ;;  %v663_v55 = vpack.c.bf16 %v639_v50, %v638_v4  ;;  %v637_v26 = vmul.f32 %v2118_v21, %v2642_v22 }
 0x15e   : > { %645 = vst [vmem:[#allocation2 + $0x28] sm:$0xff] %v629_v25  ;;  %v658_v27 = vpack.c.bf16 %v629_v25, %v628_v29 }
 0x15f   : > { %671 = vst [vmem:[#allocation3 + $0x38] sm:$0xff] %v663_v55  ;;  %653 = vst [vmem:[#allocation2 + $0x68] sm:$0xff] %v637_v26  ;;  %v662_v28 = vpack.c.bf16 %v637_v26, %v636_v30 }
 0x160   : > { %666 = vst [vmem:[#allocation3 + $0x10] sm:$0xff] %v658_v27 }
 0x161   : > { %670 = vst [vmem:[#allocation3 + $0x30] sm:$0xff] %v662_v28 }
 0x162 PF: > { %v696_v31 = vld [vmem:[#allocation3] sm:$0xff]  ;;  %v697_v32 = vld [vmem:[#allocation3 + $0x8] sm:$0xff]  ;;  %v699_v19 = vld [vmem:[#allocation3 + $0x18] sm:$0xff]  ;;  %p1180_p6 = scmp.lt.s32.totalorder %s2379_s27, 2 }
 0x163   : > { %1869 = vmatprep.subr.bf16.mxu0 %v696_v31  ;;  %v2119_v12 = vld [vmem:[#allocation6] sm:$0xff]   ;;  %v2128_v35 = vld [vmem:[%s2924_s3 + $0x8] sm:$0xff]   ;;  %v2129_v36 = vld [vmem:[%s2924_s3 + $0x10] sm:$0xff]  }
 0x164   : > { %1870 = vmatpush3.bf16.msra.mxu0 %v696_v31  ;;  %1885 = vmatprep.mubr.bf16.mxu0 %v2119_v12  ;;  %v700_v22 = vld [vmem:[#allocation3 + $0x20] sm:$0xff]  ;;  %v701_v37 = vld [vmem:[#allocation3 + $0x28] sm:$0xff]  ;;  %v2130_v10 = vld [vmem:[%s2924_s3 + $0x18] sm:$0xff]  }
 0x165   : > { %1871 = vmatprep.subr.bf16.mxu0 %v697_v32  ;;  %v2127_v34 = vld [vmem:[%s2924_s3] sm:$0xff]   ;;  %v2132_v41 = vld [vmem:[%s2924_s3 + $0x28] sm:$0xff]   ;;  %v2121_v43 = vld [vmem:[#allocation6 + $0x10] sm:$0xff]  }
 0x166   : > { %1901 = vmatprep.subr.bf16.mxu1 %v2127_v34  ;;  %v2131_v39 = vld [vmem:[%s2924_s3 + $0x20] sm:$0xff]   ;;  %v703_v40 = vld [vmem:[#allocation3 + $0x38] sm:$0xff]  ;;  %v2120_v42 = vld [vmem:[#allocation6 + $0x8] sm:$0xff]  }
 0x167   : > { %v698_v33 = vld [vmem:[#allocation3 + $0x10] sm:$0xff]  ;;  %1902 = vmatpush3.bf16.msra.mxu1 %v2127_v34  ;;  %v2122_v47 = vld [vmem:[#allocation6 + $0x18] sm:$0xff]   ;;  %v2123_v48 = vld [vmem:[#allocation6 + $0x20] sm:$0xff]  }
 0x168   : > { %1872 = vmatpush3.bf16.msra.mxu0 %v697_v32  ;;  %1903 = vmatprep.subr.bf16.mxu1 %v2128_v35  ;;  %v702_v38 = vld [vmem:[#allocation3 + $0x30] sm:$0xff]  ;;  %v2124_v51 = vld [vmem:[#allocation6 + $0x28] sm:$0xff]   ;;  %v2126_v53 = vld [vmem:[#allocation6 + $0x38] sm:$0xff]  }
 0x169   : > { %1873 = vmatprep.subr.bf16.mxu0 %v698_v33  ;;  %v2133_v46 = vld [vmem:[%s2924_s3 + $0x30] sm:$0xff]   ;;  %v2134_v54 = vld [vmem:[%s2924_s3 + $0x38] sm:$0xff]   ;;  %v2691_v44 = vld [vmem:[%s2925_s4] ss:$0 sm:$0xff] }
 0x16a   : > { %v2125_v52 = vld [vmem:[#allocation6 + $0x30] sm:$0xff]   ;;  %v1129_v25 = vld [vmem:[#allocation2 + $0x18] sm:$0xff]  ;;  %v1126_v26 = vld [vmem:[#allocation2] sm:$0xff] }
 0x16b   : > { %1904 = vmatpush3.bf16.msra.mxu1 %v2128_v35  ;;  %v1128_v50 = vld [vmem:[#allocation2 + $0x10] sm:$0xff]  ;;  %v1127_v28 = vld [vmem:[#allocation2 + $0x8] sm:$0xff] }
 0x16c   : > { %1874 = vmatpush3.bf16.msra.mxu0 %v698_v33  ;;  %1905 = vmatprep.subr.bf16.mxu1 %v2129_v36 }
 0x16d   : > { %1875 = vmatprep.subr.bf16.mxu0 %v699_v19 }
 0x16f   : > { %1906 = vmatpush3.bf16.msra.mxu1 %v2129_v36 }
 0x170   : > { %1876 = vmatpush3.bf16.msra.mxu0 %v699_v19  ;;  %1907 = vmatprep.subr.bf16.mxu1 %v2130_v10 }
 0x171   : > { %1877 = vmatprep.subr.bf16.mxu0 %v700_v22 }
 0x173   : > { %1908 = vmatpush3.bf16.msra.mxu1 %v2130_v10 }
 0x174   : > { %1878 = vmatpush3.bf16.msra.mxu0 %v700_v22  ;;  %1909 = vmatprep.subr.bf16.mxu1 %v2131_v39 }
 0x175   : > { %1879 = vmatprep.subr.bf16.mxu0 %v701_v37 }
 0x177   : > { %1910 = vmatpush3.bf16.msra.mxu1 %v2131_v39 }
 0x178   : > { %1880 = vmatpush3.bf16.msra.mxu0 %v701_v37  ;;  %1911 = vmatprep.subr.bf16.mxu1 %v2132_v41 }
 0x179   : > { %1881 = vmatprep.subr.bf16.mxu0 %v702_v38 }
 0x17b   : > { %1912 = vmatpush3.bf16.msra.mxu1 %v2132_v41 }
 0x17c   : > { %1882 = vmatpush3.bf16.msra.mxu0 %v702_v38  ;;  %1913 = vmatprep.subr.bf16.mxu1 %v2133_v46 }
 0x17d   : > { %1883 = vmatprep.subr.bf16.mxu0 %v703_v40 }
 0x17f   : > { %1914 = vmatpush3.bf16.msra.mxu1 %v2133_v46  ;;  %v1133_v46 = vld [vmem:[#allocation2 + $0x38] sm:$0xff] }
 0x180   : > { %1884 = vmatpush3.bf16.msra.mxu0 %v703_v40  ;;  %1915 = vmatprep.subr.bf16.mxu1 %v2134_v54 }
 0x183   : > { %1886 = vmatmul.mubr.bf16.vlgmr.msra.gmra.mrb[0].mxu0 %v2120_v42  ;;  %1916 = vmatpush3.bf16.msra.mxu1 %v2134_v54  ;;  %v1132_v42 = vld [vmem:[#allocation2 + $0x30] sm:$0xff] }
 0x184   : > { %1889 = vmatprep.mubr.bf16.mxu0 %v2121_v43 }
 0x18b   : > { %1890 = vmatmul.mubr.bf16.gmra.mrb[4].mxu0 %v2122_v47 }
 0x18c   : > { %1893 = vmatprep.mubr.bf16.mxu0 %v2123_v48  ;;  %v1130_v48 = vld [vmem:[#allocation2 + $0x20] sm:$0xff] }
 0x193   : > { %1894 = vmatmul.mubr.bf16.gmra.mrb[8].mxu0 %v2124_v51 }
 0x194   : > { %1897 = vmatprep.mubr.bf16.mxu0 %v2125_v52  ;;  %v1131_v52 = vld [vmem:[#allocation2 + $0x28] sm:$0xff] }
 0x19b   : > { %1898 = vmatmul.mubr.bf16.gmra.mrb[12].mxu0 %v2126_v53 }
 0x256   : > { %v1887_v56 = vpop.f32.mrb[0].mxu0 }
 0x257   : > { %v818_v57 = vpop.f32.mrb[1].mxu0 }
 0x258   : > { %v1888_v58 = vpop.f32.mrb[2].mxu0 }
 0x259   : > { %v933_v59 = vpack.c.bf16 %v1888_v58, %v1887_v56  ;;  %v821_v13 = vpop.f32.mrb[3].mxu0 }
 0x25a   : > { %v932_v60 = vpack.c.bf16 %v821_v13, %v818_v57 }
 0x25c   : > { %1917 = vmatprep.mubr.bf16.mxu1 %v932_v60 }
 0x25d   : > { %1918 = vmatmul.mubr.bf16.vlgmr.msra.gmra.mrb[0].mxu1 %v933_v59 }
 0x25e   : > { %v1891_v14 = vpop.f32.mrb[4].mxu0 }
 0x25f   : > { %v834_v61 = vpop.f32.mrb[5].mxu0 }
 0x260   : > { %v1892_v62 = vpop.f32.mrb[6].mxu0 }
 0x261   : > { %v935_v17 = vpack.c.bf16 %v1892_v62, %v1891_v14  ;;  %v837_v63 = vpop.f32.mrb[7].mxu0 }
 0x262   : > { %v934_v0 = vpack.c.bf16 %v837_v63, %v834_v61 }
 0x264   : > { %1921 = vmatprep.mubr.bf16.mxu1 %v934_v0 }
 0x265   : > { %1922 = vmatmul.mubr.bf16.gmra.mrb[4].mxu1 %v935_v17 }
 0x266   : > { %v1895_v18 = vpop.f32.mrb[8].mxu0 }
 0x267   : > { %v850_v1 = vpop.f32.mrb[9].mxu0 }
 0x268   : > { %v1896_v2 = vpop.f32.mrb[10].mxu0 }
 0x269   : > { %v937_v23 = vpack.c.bf16 %v1896_v2, %v1895_v18  ;;  %v853_v3 = vpop.f32.mrb[11].mxu0 }
 0x26a   : > { %v936_v24 = vpack.c.bf16 %v853_v3, %v850_v1  ;;  %v1136_v1 = vld [vmem:[#allocation2 + $0x50] sm:$0xff] }
 0x26c   : > { %1925 = vmatprep.mubr.bf16.mxu1 %v936_v24  ;;  %v1134_v24 = vld [vmem:[#allocation2 + $0x40] sm:$0xff] }
 0x26d   : > { %1926 = vmatmul.mubr.bf16.gmra.mrb[8].mxu1 %v937_v23  ;;  %v1137_v23 = vld [vmem:[#allocation2 + $0x58] sm:$0xff] }
 0x26e   : > { %v1899_v4 = vpop.f32.mrb[12].mxu0 }
 0x26f   : > { %v866_v5 = vpop.f32.mrb[13].mxu0 }
 0x270   : > { %v1900_v29 = vpop.f32.mrb[14].mxu0 }
 0x271   : > { %v939_v6 = vpack.c.bf16 %v1900_v29, %v1899_v4  ;;  %v869_v30 = vpop.f32.mrb[15].mxu0 }
 0x272   : > { %v938_v7 = vpack.c.bf16 %v869_v30, %v866_v5  ;;  %v1135_v5 = vld [vmem:[#allocation2 + $0x48] sm:$0xff] }
 0x274   : > { %1929 = vmatprep.mubr.bf16.mxu1 %v938_v7 }
 0x275   : > { %1930 = vmatmul.mubr.bf16.gmra.mrb[12].mxu1 %v939_v6 }
 0x330   : > { %v1919_v8 = vpop.f32.mrb[0].mxu1 }
 0x331   : > { %v1054_v9 = vadd.f32 %v1919_v8, %v2691_v44  ;;  %v1045_v11 = vpop.f32.mrb[1].mxu1 }
 0x332   : > { %v1046_v45 = vadd.f32 %v2691_v44, %v1045_v11  ;;  %v1920_v15 = vpop.f32.mrb[2].mxu1 }
 0x333   : > { %v1110_v16 = vmax.f32 %v1054_v9, 0.0  ;;  %v1057_v49 = vadd.f32 %v1920_v15, %v2691_v44  ;;  %v1048_v20 = vpop.f32.mrb[3].mxu1 }
 0x334   : > { %v1108_v21 = vmax.f32 %v1046_v45, 0.0  ;;  %v1049_v55 = vadd.f32 %v2691_v44, %v1048_v20 }
 0x335   : > { %v1111_v27 = vmax.f32 %v1057_v49, 0.0  ;;  %v1144_v32 = vadd.f32 %v1128_v50, %v1110_v16 }
 0x336   : > { %v1109_v31 = vmax.f32 %v1049_v55, 0.0  ;;  %v1142_v33 = vadd.f32 %v1126_v26, %v1108_v21  ;;  %v1140_v55 = vld [vmem:[#allocation2 + $0x70] sm:$0xff] }
 0x337   : > { %v1145_v12 = vadd.f32 %v1129_v25, %v1111_v27  ;;  %v1141_v27 = vld [vmem:[#allocation2 + $0x78] sm:$0xff] }
 0x338   : > { %v1143_v19 = vadd.f32 %v1127_v28, %v1109_v31  ;;  %v1923_v22 = vpop.f32.mrb[4].mxu1  ;;  %v1138_v31 = vld [vmem:[#allocation2 + $0x60] sm:$0xff] }
 0x339   : > { %v1159_v34 = vpack.c.bf16 %v1145_v12, %v1144_v32  ;;  %v1070_v35 = vadd.f32 %v1923_v22, %v2691_v44  ;;  %v1061_v36 = vpop.f32.mrb[5].mxu1  ;;  %v1139_v12 = vld [vmem:[#allocation2 + $0x68] sm:$0xff] }
 0x33a   : > { %v1158_v37 = vpack.c.bf16 %v1143_v19, %v1142_v33  ;;  %v1062_v10 = vadd.f32 %v2691_v44, %v1061_v36  ;;  %v1924_v38 = vpop.f32.mrb[6].mxu1 }
 0x33b   : > { %1171 = vst [vmem:[#allocation4 + $0x8] sm:$0xff] %v1159_v34  ;;  %v1114_v39 = vmax.f32 %v1070_v35, 0.0  ;;  %v1073_v40 = vadd.f32 %v1924_v38, %v2691_v44  ;;  %v1064_v41 = vpop.f32.mrb[7].mxu1 }
 0x33c   : > { %1170 = vst [vmem:[#allocation4] sm:$0xff] %v1158_v37  ;;  %v1112_v43 = vmax.f32 %v1062_v10, 0.0  ;;  %v1065_v47 = vadd.f32 %v2691_v44, %v1064_v41 }
 0x33d   : > { %v1115_v51 = vmax.f32 %v1073_v40, 0.0  ;;  %v1148_v54 = vadd.f32 %v1132_v42, %v1114_v39 }
 0x33e   : > { %v1113_v53 = vmax.f32 %v1065_v47, 0.0  ;;  %v1146_v57 = vadd.f32 %v1130_v48, %v1112_v43 }
 0x33f   : > { %v1149_v56 = vadd.f32 %v1133_v46, %v1115_v51 }
 0x340   : > { %v1147_v58 = vadd.f32 %v1131_v52, %v1113_v53  ;;  %v1927_v59 = vpop.f32.mrb[8].mxu1 }
 0x341   : > { %v1161_v13 = vpack.c.bf16 %v1149_v56, %v1148_v54  ;;  %v1086_v60 = vadd.f32 %v1927_v59, %v2691_v44  ;;  %v1077_v14 = vpop.f32.mrb[9].mxu1 }
 0x342   : > { %v1160_v61 = vpack.c.bf16 %v1147_v58, %v1146_v57  ;;  %v1078_v62 = vadd.f32 %v2691_v44, %v1077_v14  ;;  %v1928_v17 = vpop.f32.mrb[10].mxu1  ;;  %v1186_v38 = vld [vmem:[#allocation4 + $0x8] sm:$0xff] (%p1180_p6) }
 0x343   : > { %1173 = vst [vmem:[#allocation4 + $0x18] sm:$0xff] %v1161_v13  ;;  %v1118_v63 = vmax.f32 %v1086_v60, 0.0  ;;  %v1089_v0 = vadd.f32 %v1928_v17, %v2691_v44  ;;  %v1080_v18 = vpop.f32.mrb[11].mxu1  ;;  %v1185_v10 = vld [vmem:[#allocation4] sm:$0xff] (%p1180_p6)  ;;  %1194 = vst [vmem:[#allocation3 + $0x8] sm:$0xff] (%p1180_p6), %v1186_v38 }
 0x344   : > { %1172 = vst [vmem:[#allocation4 + $0x10] sm:$0xff] %v1160_v61  ;;  %v1116_v2 = vmax.f32 %v1078_v62, 0.0  ;;  %v1081_v3 = vadd.f32 %v2691_v44, %v1080_v18  ;;  %1193 = vst [vmem:[#allocation3] sm:$0xff] (%p1180_p6), %v1185_v10 }
 0x345   : > { %v1119_v4 = vmax.f32 %v1089_v0, 0.0  ;;  %v1152_v6 = vadd.f32 %v1136_v1, %v1118_v63 }
 0x346   : > { %v1117_v29 = vmax.f32 %v1081_v3, 0.0  ;;  %v1150_v7 = vadd.f32 %v1134_v24, %v1116_v2 }
 0x347   : > { %v1153_v30 = vadd.f32 %v1137_v23, %v1119_v4 }
 0x348   : > { %v1151_v8 = vadd.f32 %v1135_v5, %v1117_v29  ;;  %v1931_v9 = vpop.f32.mrb[12].mxu1 }
 0x349   : > { %v1163_v11 = vpack.c.bf16 %v1153_v30, %v1152_v6  ;;  %v1102_v45 = vadd.f32 %v1931_v9, %v2691_v44  ;;  %v1093_v15 = vpop.f32.mrb[13].mxu1 }
 0x34a   : > { %v1162_v16 = vpack.c.bf16 %v1151_v8, %v1150_v7  ;;  %v1094_v49 = vadd.f32 %v2691_v44, %v1093_v15  ;;  %v1932_v20 = vpop.f32.mrb[14].mxu1 }
 0x34b   : > { %1175 = vst [vmem:[#allocation4 + $0x28] sm:$0xff] %v1163_v11  ;;  %v1122_v50 = vmax.f32 %v1102_v45, 0.0  ;;  %v1105_v21 = vadd.f32 %v1932_v20, %v2691_v44  ;;  %v1096_v25 = vpop.f32.mrb[15].mxu1  ;;  %v1187_v39 = vld [vmem:[#allocation4 + $0x10] sm:$0xff] (%p1180_p6) }
 0x34c   : > { %1174 = vst [vmem:[#allocation4 + $0x20] sm:$0xff] %v1162_v16  ;;  %v1120_v26 = vmax.f32 %v1094_v49, 0.0  ;;  %v1097_v28 = vadd.f32 %v2691_v44, %v1096_v25  ;;  %1195 = vst [vmem:[#allocation3 + $0x10] sm:$0xff] (%p1180_p6), %v1187_v39  ;;  %v1188_v44 = vld [vmem:[#allocation4 + $0x18] sm:$0xff] (%p1180_p6) }
 0x34d   : > { %v1123_v32 = vmax.f32 %v1105_v21, 0.0  ;;  %v1156_v19 = vadd.f32 %v1140_v55, %v1122_v50  ;;  %1196 = vst [vmem:[#allocation3 + $0x18] sm:$0xff] (%p1180_p6), %v1188_v44 }
 0x34e   : > { %v1121_v33 = vmax.f32 %v1097_v28, 0.0  ;;  %v1154_v34 = vadd.f32 %v1138_v31, %v1120_v26  ;;  %1184 = sbr.rel (!%p1180_p6) target bundleno = 861 (0x35d), region = 76 }
 0x34f   : > { %v1157_v22 = vadd.f32 %v1141_v27, %v1123_v32 }
 0x350   : > { %v1155_v35 = vadd.f32 %v1139_v12, %v1121_v33 }
 0x351   : > { %v1165_v36 = vpack.c.bf16 %v1157_v22, %v1156_v19 }
 0x352   : > { %v1164_v37 = vpack.c.bf16 %v1155_v35, %v1154_v34  ;;  %v1190_v41 = vld [vmem:[#allocation4 + $0x28] sm:$0xff] (%p1180_p6) }
 0x353   : > { %1177 = vst [vmem:[#allocation4 + $0x38] sm:$0xff] %v1165_v36  ;;  %v1189_v40 = vld [vmem:[#allocation4 + $0x20] sm:$0xff] (%p1180_p6)  ;;  %1198 = vst [vmem:[#allocation3 + $0x28] sm:$0xff] (%p1180_p6), %v1190_v41 }
 0x354   : > { %1176 = vst [vmem:[#allocation4 + $0x30] sm:$0xff] %v1164_v37  ;;  %1197 = vst [vmem:[#allocation3 + $0x20] sm:$0xff] (%p1180_p6), %v1189_v40 }
 0x35a   : > { %v1192_v43 = vld [vmem:[#allocation4 + $0x38] sm:$0xff] }
 0x35b   : > { %v1191_v42 = vld [vmem:[#allocation4 + $0x30] sm:$0xff]  ;;  %1200 = vst [vmem:[#allocation3 + $0x38] sm:$0xff] %v1192_v43 }
 0x35c   : > { %1199 = vst [vmem:[#allocation3 + $0x30] sm:$0xff] %v1191_v42 }
 0x35d PF: > { %p1201_p4 = scmp.eq.s32.totalorder %s2379_s27, 2 }
 0x35e   : > { %v2712_v46 = vld [vmem:[#allocation4] sm:$0xff] (%p1201_p4)  ;;  %v2714_v47 = vld [vmem:[#allocation4 + $0x8] sm:$0xff] (%p1201_p4)  ;;  %v2716_v48 = vld [vmem:[#allocation4 + $0x10] sm:$0xff] (%p1201_p4)  ;;  %vm2394_vm1 = vmmov (%p1201_p4), 0  }
 0x35f   : > { %1205 = sbr.rel (!%p1201_p4) target bundleno = 1424 (0x590), region = 80  ;;  %v1214_v51 = vunpack.c.l.bf16 (%p1201_p4), %v2712_v46  ;;  %v1215_v52 = vunpack.c.h.bf16 (%p1201_p4), %v2712_v46  ;;  %v1216_v53 = vunpack.c.l.bf16 (%p1201_p4), %v2714_v47  ;;  %v1217_v54 = vunpack.c.h.bf16 (%p1201_p4), %v2714_v47  ;;  %v2722_v56 = vld [vmem:[#allocation4 + $0x18] sm:$0xff] (%p1201_p4)  ;;  %v2728_v60 = vld [vmem:[#allocation4 + $0x20] sm:$0xff] (%p1201_p4)  ;;  %v2746_v2 = vld [vmem:[#allocation4 + $0x28] sm:$0xff] (%p1201_p4) }
 0x360   : > { %v1218_v57 = vunpack.c.l.bf16 (%p1201_p4), %v2716_v48  ;;  %v1219_v58 = vunpack.c.h.bf16 (%p1201_p4), %v2716_v48  ;;  %v1220_v59 = vunpack.c.l.bf16 (%p1201_p4), %v2722_v56  ;;  %v1221_v13 = vunpack.c.h.bf16 (%p1201_p4), %v2722_v56  ;;  %v2135_v23 = vld [vmem:[#allocation9] sm:$0xff] (%p1201_p4)  }
 0x361   : > { %v1230_v14 = vsub.f32 (%p1201_p4), 0.0, %v1214_v51  ;;  %v1231_v61 = vsub.f32 (%p1201_p4), 0.0, %v1215_v52  ;;  %v1232_v62 = vsub.f32 (%p1201_p4), 0.0, %v1216_v53  ;;  %v1233_v17 = vsub.f32 (%p1201_p4), 0.0, %v1217_v54  ;;  %1949 = vmatprep.mubr.bf16.mxu0 (%p1201_p4), %v2135_v23 }
 0x362   : > { %v1234_v63 = vsub.f32 (%p1201_p4), 0.0, %v1218_v57  ;;  %v1235_v0 = vsub.f32 (%p1201_p4), 0.0, %v1219_v58  ;;  %v1236_v18 = vsub.f32 (%p1201_p4), 0.0, %v1220_v59  ;;  %v1237_v1 = vsub.f32 (%p1201_p4), 0.0, %v1221_v13  ;;  %v2765_v34 = vld [vmem:[#allocation4 + $0x38] sm:$0xff] (%p1201_p4) }
 0x363   : > { %v1246_v3 = vmul.f32 (%p1201_p4), 1.442695, %v1230_v14  ;;  %v1248_v24 = vmul.f32 (%p1201_p4), 1.442695, %v1231_v61  ;;  %v1250_v4 = vmul.f32 (%p1201_p4), 1.442695, %v1232_v62  ;;  %v1222_v5 = vunpack.c.l.bf16 (%p1201_p4), %v2728_v60 }
 0x364   : > { %v1252_v29 = vmul.f32 (%p1201_p4), 1.442695, %v1233_v17  ;;  %v1254_v6 = vmul.f32 (%p1201_p4), 1.442695, %v1234_v63  ;;  %v1223_v30 = vunpack.c.h.bf16 (%p1201_p4), %v2728_v60  ;;  %v2750_v7 = vld [vmem:[#allocation4 + $0x30] sm:$0xff] (%p1201_p4)  ;;  %v1224_v15 = vunpack.c.l.bf16 (%p1201_p4), %v2746_v2 }
 0x365   : > { %2143 = vpow2.f32 (%p1201_p4), %v1246_v3  ;;  %v1256_v8 = vmul.f32 (%p1201_p4), 1.442695, %v1235_v0  ;;  %v1258_v9 = vmul.f32 (%p1201_p4), 1.442695, %v1236_v18  ;;  %v1238_v11 = vsub.f32 (%p1201_p4), 0.0, %v1222_v5 }
 0x366   : > { %2145 = vpow2.f32 %v1248_v24  ;;  %v1239_v45 = vsub.f32 0.0, %v1223_v30  ;;  %v1225_v16 = vunpack.c.h.bf16 %v2746_v2  ;;  %v1260_v49 = vmul.f32 1.442695, %v1237_v1 }
 0x367   : > { %2147 = vpow2.f32 %v1250_v4  ;;  %v1226_v20 = vunpack.c.l.bf16 %v2750_v7  ;;  %v1262_v50 = vmul.f32 1.442695, %v1238_v11  ;;  %v1240_v21 = vsub.f32 0.0, %v1224_v15 }
 0x368   : > { %2149 = vpow2.f32 %v1252_v29  ;;  %v1241_v25 = vsub.f32 0.0, %v1225_v16  ;;  %v1264_v26 = vmul.f32 1.442695, %v1239_v45  ;;  %v1227_v37 = vunpack.c.h.bf16 %v2750_v7  ;;  %v2138_v7 = vld [vmem:[#allocation9 + $0x18] sm:$0xff]  }
 0x369   : > { %2151 = vpow2.f32 %v1254_v6  ;;  %v1242_v55 = vsub.f32 0.0, %v1226_v20  ;;  %v1266_v27 = vmul.f32 1.442695, %v1240_v21  ;;  %v1228_v40 = vunpack.c.l.bf16 %v2765_v34 }
 0x36a   : > { %2153 = vpow2.f32 %v1256_v8  ;;  %v1268_v28 = vmul.f32 1.442695, %v1241_v25  ;;  %v1229_v43 = vunpack.c.h.bf16 %v2765_v34  ;;  %v1243_v62 = vsub.f32 0.0, %v1227_v37 }
 0x36b   : > { %2155 = vpow2.f32 %v1258_v9  ;;  %v1270_v31 = vmul.f32 1.442695, %v1242_v55  ;;  %v1244_v1 = vsub.f32 0.0, %v1228_v40  ;;  %v2393_v34 = vmov 0.0  }
 0x36c   : > { %2157 = vpow2.f32 %v1260_v49  ;;  %v1245_v24 = vsub.f32 0.0, %v1229_v43  ;;  %v1272_v6 = vmul.f32 1.442695, %v1243_v62  ;;  %1965 = vmatprep.subr.bf16.mxu1 %v2393_v34  ;;  %1981 = vmatprep.mubr.msk.bf16.mxu1 %vm2394_vm1, %v2393_v34 }
 0x36d   : > { %2159 = vpow2.f32 %v1262_v50  ;;  %v1274_v45 = vmul.f32 1.442695, %v1244_v1  ;;  %v2136_v1 = vld [vmem:[#allocation9 + $0x8] sm:$0xff]  }
 0x36e   : > { %2161 = vpow2.f32 %v1264_v26  ;;  %v1276_v21 = vmul.f32 1.442695, %v1245_v24 }
 0x36f   : > { %v2144_v32 = vpop.eup %2143  ;;  %2163 = vpow2.f32 %v1266_v27 }
 0x370   : > { %v2146_v12 = vpop.eup %2145  ;;  %v1278_v33 = vadd.f32 1.0, %v2144_v32  ;;  %2165 = vpow2.f32 %v1268_v28 }
 0x371   : > { %v2148_v19 = vpop.eup %2147  ;;  %v1279_v22 = vadd.f32 1.0, %v2146_v12  ;;  %2167 = vpow2.f32 %v1270_v31 }
 0x372   : > { %v2150_v35 = vpop.eup %2149  ;;  %2169 = vrcp.f32 %v1278_v33  ;;  %v1280_v36 = vadd.f32 1.0, %v2148_v19 }
 0x373   : > { %v2152_v10 = vpop.eup %2151  ;;  %2171 = vrcp.f32 %v1279_v22  ;;  %v1281_v38 = vadd.f32 1.0, %v2150_v35 }
 0x374   : > { %v2154_v39 = vpop.eup %2153  ;;  %2173 = vrcp.f32 %v1280_v36  ;;  %v1282_v44 = vadd.f32 1.0, %v2152_v10 }
 0x375   : > { %v2156_v41 = vpop.eup %2155  ;;  %2175 = vrcp.f32 %v1281_v38  ;;  %v1283_v42 = vadd.f32 1.0, %v2154_v39 }
 0x376   : > { %v2158_v14 = vpop.eup %2157  ;;  %2177 = vrcp.f32 %v1282_v44  ;;  %v1284_v61 = vadd.f32 1.0, %v2156_v41 }
 0x377   : > { %v2160_v17 = vpop.eup %2159  ;;  %2179 = vrcp.f32 %v1283_v42  ;;  %v1285_v63 = vadd.f32 1.0, %v2158_v14 }
 0x378   : > { %v2162_v0 = vpop.eup %2161  ;;  %2181 = vrcp.f32 %v1284_v61  ;;  %v1286_v18 = vadd.f32 1.0, %v2160_v17 }
 0x379   : > { %v2164_v23 = vpop.eup %2163  ;;  %2183 = vrcp.f32 %v1285_v63  ;;  %v1287_v3 = vadd.f32 1.0, %v2162_v0 }
 0x37a   : > { %v2166_v4 = vpop.eup %2165  ;;  %2185 = vrcp.f32 %v1286_v18  ;;  %v1288_v29 = vadd.f32 1.0, %v2164_v23  ;;  %v2140_v23 = vld [vmem:[#allocation9 + $0x28] sm:$0xff]  }
 0x37b   : > { %v2168_v8 = vpop.eup %2167  ;;  %2187 = vrcp.f32 %v1287_v3  ;;  %v1289_v9 = vadd.f32 1.0, %v2166_v4  ;;  %v2141_v3 = vld [vmem:[#allocation9 + $0x30] sm:$0xff]  }
 0x37c   : > { %v2170_v11 = vpop.eup %2169  ;;  %2189 = vrcp.f32 %v1288_v29 }
 0x37d   : > { %v2172_v49 = vpop.eup %2171  ;;  %v1310_v50 = vmul.f32 %v2170_v11, %v1214_v51  ;;  %2191 = vpow2.f32 %v1272_v6 }
 0x37e   : > { %v2174_v25 = vpop.eup %2173  ;;  %v1311_v55 = vmul.f32 %v2172_v49, %v1215_v52  ;;  %2193 = vrcp.f32 %v1289_v9 }
 0x37f   : > { %v2176_v26 = vpop.eup %2175  ;;  %v1312_v27 = vmul.f32 %v2174_v25, %v1216_v53  ;;  %2195 = vpow2.f32 %v1274_v45  ;;  %v1290_v53 = vadd.f32 1.0, %v2168_v8 }
 0x380   : > { %v2178_v28 = vpop.eup %2177  ;;  %v1326_v31 = vpack.c.bf16 %v1311_v55, %v1310_v50  ;;  %v1313_v32 = vmul.f32 %v2176_v26, %v1217_v54  ;;  %2197 = vpow2.f32 %v1276_v21 }
 0x381   : > { %v2180_v12 = vpop.eup %2179  ;;  %v1314_v51 = vmul.f32 %v2178_v28, %v1218_v57  ;;  %2199 = vrcp.f32 %v1290_v53 }
 0x382   : > { %v2182_v33 = vpop.eup %2181  ;;  %1933 = vmatprep.subr.bf16.mxu0 %v1326_v31  ;;  %v1327_v46 = vpack.c.bf16 %v1313_v32, %v1312_v27  ;;  %v1315_v52 = vmul.f32 %v2180_v12, %v1219_v58 }
 0x383   : > { %v2184_v19 = vpop.eup %2183  ;;  %1934 = vmatpush3.bf16.msra.mxu0 %v1326_v31  ;;  %v1316_v47 = vmul.f32 %v2182_v33, %v1220_v59 }
 0x384   : > { %v2186_v22 = vpop.eup %2185  ;;  %1935 = vmatprep.subr.bf16.mxu0 %v1327_v46  ;;  %v1328_v35 = vpack.c.bf16 %v1315_v52, %v1314_v51  ;;  %v1317_v54 = vmul.f32 %v2184_v19, %v1221_v13 }
 0x385   : > { %v2188_v57 = vpop.eup %2187  ;;  %v1318_v58 = vmul.f32 %v2186_v22, %v1222_v5 }
 0x386   : > { %v2190_v36 = vpop.eup %2189  ;;  %v1329_v48 = vpack.c.bf16 %v1317_v54, %v1316_v47  ;;  %v1319_v38 = vmul.f32 %v2188_v57, %v1223_v30 }
 0x387   : > { %1936 = vmatpush3.bf16.msra.mxu0 %v1327_v46  ;;  %v2192_v10 = vpop.eup %2191  ;;  %v1320_v42 = vmul.f32 %v2190_v36, %v1224_v15 }
 0x388   : > { %1937 = vmatprep.subr.bf16.mxu0 %v1328_v35  ;;  %v2194_v39 = vpop.eup %2193  ;;  %v1291_v44 = vadd.f32 1.0, %v2192_v10  ;;  %v1330_v13 = vpack.c.bf16 %v1319_v38, %v1318_v58 }
 0x389   : > { %v2196_v41 = vpop.eup %2195  ;;  %v1321_v14 = vmul.f32 %v2194_v39, %v1225_v16 }
 0x38a   : > { %v2198_v59 = vpop.eup %2197  ;;  %2201 = vrcp.f32 %v1291_v44  ;;  %v1292_v56 = vadd.f32 1.0, %v2196_v41 }
 0x38b   : > { %1938 = vmatpush3.bf16.msra.mxu0 %v1328_v35  ;;  %v1293_v61 = vadd.f32 1.0, %v2198_v59  ;;  %v1331_v60 = vpack.c.bf16 %v1321_v14, %v1320_v42  ;;  %v2200_v5 = vpop.eup %2199 }
 0x38c   : > { %1939 = vmatprep.subr.bf16.mxu0 %v1329_v48  ;;  %2203 = vrcp.f32 %v1292_v56  ;;  %v1322_v30 = vmul.f32 %v2200_v5, %v1226_v20  ;;  %v2137_v20 = vld [vmem:[#allocation9 + $0x10] sm:$0xff]  }
 0x38d   : > { %2205 = vrcp.f32 %v1293_v61 }
 0x38f   : > { %1940 = vmatpush3.bf16.msra.mxu0 %v1329_v48 }
 0x390   : > { %1941 = vmatprep.subr.bf16.mxu0 %v1330_v13 }
 0x393   : > { %1942 = vmatpush3.bf16.msra.mxu0 %v1330_v13 }
 0x394   : > { %1943 = vmatprep.subr.bf16.mxu0 %v1331_v60  ;;  %v2202_v62 = vpop.eup %2201 }
 0x395   : > { %v1323_v17 = vmul.f32 %v2202_v62, %v1227_v37  ;;  %v2139_v37 = vld [vmem:[#allocation9 + $0x20] sm:$0xff]  }
 0x396   : > { %v2204_v15 = vpop.eup %2203 }
 0x397   : > { %1944 = vmatpush3.bf16.msra.mxu0 %v1331_v60  ;;  %v2206_v2 = vpop.eup %2205  ;;  %v1332_v16 = vpack.c.bf16 %v1323_v17, %v1322_v30  ;;  %v1324_v63 = vmul.f32 %v2204_v15, %v1228_v40  ;;  %v2142_v40 = vld [vmem:[#allocation9 + $0x38] sm:$0xff]  }
 0x398   : > { %v1325_v0 = vmul.f32 %v2206_v2, %v1229_v43 }
 0x399   : > { %1945 = vmatprep.subr.bf16.mxu0 %v1332_v16 }
 0x39a   : > { %v1333_v18 = vpack.c.bf16 %v1325_v0, %v1324_v63 }
 0x39b   : > { %1946 = vmatpush3.bf16.msra.mxu0 %v1332_v16 }
 0x39c   : > { %1947 = vmatprep.subr.bf16.mxu0 %v1333_v18 }
 0x39f   : > { %1948 = vmatpush3.bf16.msra.mxu0 %v1333_v18 }
 0x3a2   : > { %1950 = vmatmul.mubr.bf16.vlgmr.msra.gmra.mrb[0].mxu0 %v2136_v1 }
 0x3a3   : > { %1953 = vmatprep.mubr.bf16.mxu0 %v2137_v20 }
 0x3aa   : > { %1954 = vmatmul.mubr.bf16.gmra.mrb[4].mxu0 %v2138_v7 }
 0x3ab   : > { %1957 = vmatprep.mubr.bf16.mxu0 %v2139_v37 }
 0x3b2   : > { %1958 = vmatmul.mubr.bf16.gmra.mrb[8].mxu0 %v2140_v23 }
 0x3b3   : > { %1961 = vmatprep.mubr.bf16.mxu0 %v2141_v3 }
 0x3ba   : > { %1962 = vmatmul.mubr.bf16.gmra.mrb[12].mxu0 %v2142_v40 }
 0x475   : > { %v2810_v43 = vpop.f32.mrb[0].mxu0 }
 0x476   : > { %v1497_v24 = vsub.f32 0.0, %v2810_v43  ;;  %v2813_v4 = vpop.f32.mrb[1].mxu0 }
 0x477   : > { %v1495_v29 = vsub.f32 0.0, %v2813_v4  ;;  %v2816_v6 = vpop.f32.mrb[2].mxu0 }
 0x478   : > { %v1515_v8 = vmul.f32 1.442695, %v1497_v24  ;;  %v1498_v9 = vsub.f32 0.0, %v2816_v6  ;;  %v2819_v11 = vpop.f32.mrb[3].mxu0 }
 0x479   : > { %v1511_v45 = vmul.f32 1.442695, %v1495_v29  ;;  %v1496_v49 = vsub.f32 0.0, %v2819_v11 }
 0x47a   : > { %2207 = vpow2.f32 %v1515_v8  ;;  %v1517_v50 = vmul.f32 1.442695, %v1498_v9 }
 0x47b   : > { %2209 = vpow2.f32 %v1511_v45  ;;  %v1513_v21 = vmul.f32 1.442695, %v1496_v49 }
 0x47c   : > { %2211 = vpow2.f32 %v1517_v50 }
 0x47d   : > { %2213 = vpow2.f32 %v1513_v21  ;;  %v2822_v25 = vpop.f32.mrb[4].mxu0 }
 0x47e   : > { %v1501_v55 = vsub.f32 0.0, %v2822_v25  ;;  %v2825_v26 = vpop.f32.mrb[5].mxu0 }
 0x47f   : > { %v1499_v27 = vsub.f32 0.0, %v2825_v26  ;;  %v2828_v28 = vpop.f32.mrb[6].mxu0 }
 0x480   : > { %v1523_v31 = vmul.f32 1.442695, %v1501_v55  ;;  %v1502_v32 = vsub.f32 0.0, %v2828_v28  ;;  %v2831_v12 = vpop.f32.mrb[7].mxu0 }
 0x481   : > { %v1519_v51 = vmul.f32 1.442695, %v1499_v27  ;;  %v1500_v33 = vsub.f32 0.0, %v2831_v12 }
 0x482   : > { %2215 = vpow2.f32 %v1523_v31  ;;  %v1525_v46 = vmul.f32 1.442695, %v1502_v32 }
 0x483   : > { %2217 = vpow2.f32 %v1519_v51  ;;  %v1521_v52 = vmul.f32 1.442695, %v1500_v33 }
 0x484   : > { %v2208_v19 = vpop.eup %2207  ;;  %2219 = vpow2.f32 %v1525_v46 }
 0x485   : > { %v2210_v53 = vpop.eup %2209  ;;  %v1545_v22 = vadd.f32 1.0, %v2208_v19  ;;  %2221 = vpow2.f32 %v1521_v52  ;;  %v2834_v35 = vpop.f32.mrb[8].mxu0 }
 0x486   : > { %v2212_v47 = vpop.eup %2211  ;;  %v1543_v54 = vadd.f32 1.0, %v2210_v53  ;;  %v1505_v57 = vsub.f32 0.0, %v2834_v35  ;;  %v2837_v36 = vpop.f32.mrb[9].mxu0 }
 0x487   : > { %v2214_v10 = vpop.eup %2213  ;;  %2223 = vrcp.f32 %v1545_v22  ;;  %v1546_v48 = vadd.f32 1.0, %v2212_v47  ;;  %v1503_v58 = vsub.f32 0.0, %v2837_v36  ;;  %v2840_v38 = vpop.f32.mrb[10].mxu0 }
 0x488   : > { %2225 = vrcp.f32 %v1543_v54  ;;  %v1544_v39 = vadd.f32 1.0, %v2214_v10  ;;  %v1531_v44 = vmul.f32 1.442695, %v1505_v57  ;;  %v1506_v41 = vsub.f32 0.0, %v2840_v38  ;;  %v2843_v59 = vpop.f32.mrb[11].mxu0 }
 0x489   : > { %2227 = vrcp.f32 %v1546_v48  ;;  %v1527_v56 = vmul.f32 1.442695, %v1503_v58  ;;  %v1504_v13 = vsub.f32 0.0, %v2843_v59 }
 0x48a   : > { %2229 = vrcp.f32 %v1544_v39  ;;  %v1533_v42 = vmul.f32 1.442695, %v1506_v41 }
 0x48b   : > { %2231 = vpow2.f32 %v1531_v44  ;;  %v1529_v14 = vmul.f32 1.442695, %v1504_v13 }
 0x48c   : > { %v2216_v61 = vpop.eup %2215  ;;  %2233 = vpow2.f32 %v1527_v56 }
 0x48d   : > { %v2218_v60 = vpop.eup %2217  ;;  %v1549_v5 = vadd.f32 1.0, %v2216_v61  ;;  %2235 = vpow2.f32 %v1533_v42  ;;  %v2846_v30 = vpop.f32.mrb[12].mxu0 }
 0x48e   : > { %v2220_v62 = vpop.eup %2219  ;;  %v1547_v17 = vadd.f32 1.0, %v2218_v60  ;;  %2237 = vpow2.f32 %v1529_v14  ;;  %v1509_v15 = vsub.f32 0.0, %v2846_v30  ;;  %v2849_v2 = vpop.f32.mrb[13].mxu0 }
 0x48f   : > { %v2222_v16 = vpop.eup %2221  ;;  %2239 = vrcp.f32 %v1549_v5  ;;  %v1550_v63 = vadd.f32 1.0, %v2220_v62  ;;  %v1507_v0 = vsub.f32 0.0, %v2849_v2  ;;  %v2852_v18 = vpop.f32.mrb[14].mxu0 }
 0x490   : > { %2241 = vrcp.f32 %v1547_v17  ;;  %v1548_v1 = vadd.f32 1.0, %v2222_v16  ;;  %v1539_v20 = vmul.f32 1.442695, %v1509_v15  ;;  %v1510_v7 = vsub.f32 0.0, %v2852_v18  ;;  %v2855_v37 = vpop.f32.mrb[15].mxu0 }
 0x491   : > { %v2224_v23 = vpop.eup %2223  ;;  %2243 = vrcp.f32 %v1550_v63  ;;  %v1535_v3 = vmul.f32 1.442695, %v1507_v0  ;;  %v1508_v40 = vsub.f32 0.0, %v2855_v37 }
 0x492   : > { %v2226_v24 = vpop.eup %2225  ;;  %2245 = vrcp.f32 %v1548_v1  ;;  %v1541_v29 = vmul.f32 1.442695, %v1510_v7  ;;  %v1577_v49 = vmul.f32 %v2224_v23, %v2810_v43 }
 0x493   : > { %v2228_v8 = vpop.eup %2227  ;;  %2247 = vpow2.f32 %v1539_v20  ;;  %v1537_v9 = vmul.f32 1.442695, %v1508_v40  ;;  %v1575_v55 = vmul.f32 %v2226_v24, %v2813_v4 }
 0x494   : > { %v2230_v45 = vpop.eup %2229  ;;  %v1578_v50 = vmul.f32 %v2228_v8, %v2816_v6  ;;  %2249 = vpow2.f32 %v1535_v3  ;;  %v1599_v3 = vld [vmem:[%s2928_s7] sm:$0xf] }
 0x495   : > { %v2232_v21 = vpop.eup %2231  ;;  %v1576_v27 = vmul.f32 %v2230_v45, %v2819_v11  ;;  %2251 = vpow2.f32 %v1541_v29 }
 0x496   : > { %v2234_v31 = vpop.eup %2233  ;;  %v1592_v32 = vpack.c.bf16 %v1578_v50, %v1577_v49  ;;  %v1553_v51 = vadd.f32 1.0, %v2232_v21  ;;  %2253 = vpow2.f32 %v1537_v9 }
 0x497   : > { %v2236_v33 = vpop.eup %2235  ;;  %v1551_v46 = vadd.f32 1.0, %v2234_v31  ;;  %v1591_v52 = vpack.c.bf16 %v1576_v27, %v1575_v55 }
 0x498   : > { %v2238_v19 = vpop.eup %2237  ;;  %2255 = vrcp.f32 %v1553_v51  ;;  %v1554_v53 = vadd.f32 1.0, %v2236_v33 }
 0x499   : > { %v2240_v43 = vpop.eup %2239  ;;  %2257 = vrcp.f32 %v1551_v46  ;;  %v1552_v6 = vadd.f32 1.0, %v2238_v19  ;;  %1966 = vmatpush3.bf16.msra.mxu1 %v1591_v52 }
 0x49a   : > { %v2242_v22 = vpop.eup %2241  ;;  %2259 = vrcp.f32 %v1554_v53  ;;  %1967 = vmatprep.subr.bf16.mxu1 %v2393_v34  ;;  %v1581_v47 = vmul.f32 %v2240_v43, %v2822_v25 }
 0x49b   : > { %v2244_v4 = vpop.eup %2243  ;;  %2261 = vrcp.f32 %v1552_v6  ;;  %v1579_v10 = vmul.f32 %v2242_v22, %v2825_v26 }
 0x49c   : > { %v2246_v11 = vpop.eup %2245  ;;  %v1582_v54 = vmul.f32 %v2244_v4, %v2828_v28 }
 0x49d   : > { %v2248_v57 = vpop.eup %2247  ;;  %v1580_v48 = vmul.f32 %v2246_v11, %v2831_v12  ;;  %1968 = vmatpush3.bf16.msra.mxu1 %v1592_v32 }
 0x49e   : > { %v2250_v58 = vpop.eup %2249  ;;  %v1594_v39 = vpack.c.bf16 %v1582_v54, %v1581_v47  ;;  %v1557_v44 = vadd.f32 1.0, %v2248_v57  ;;  %1969 = vmatprep.subr.bf16.mxu1 %v2393_v34 }
 0x49f   : > { %v2252_v41 = vpop.eup %2251  ;;  %v1593_v56 = vpack.c.bf16 %v1580_v48, %v1579_v10  ;;  %v1555_v13 = vadd.f32 1.0, %v2250_v58 }
 0x4a0   : > { %v2254_v42 = vpop.eup %2253  ;;  %2263 = vrcp.f32 %v1557_v44  ;;  %v1558_v14 = vadd.f32 1.0, %v2252_v41 }
 0x4a1   : > { %2265 = vrcp.f32 %v1555_v13  ;;  %v1556_v25 = vadd.f32 1.0, %v2254_v42  ;;  %1970 = vmatpush3.bf16.msra.mxu1 %v1593_v56 }
 0x4a2   : > { %v2256_v28 = vpop.eup %2255  ;;  %2267 = vrcp.f32 %v1558_v14  ;;  %1971 = vmatprep.subr.bf16.mxu1 %v2393_v34 }
 0x4a3   : > { %v2258_v26 = vpop.eup %2257  ;;  %2269 = vrcp.f32 %v1556_v25  ;;  %v1585_v60 = vmul.f32 %v2256_v28, %v2834_v35 }
 0x4a4   : > { %v2260_v12 = vpop.eup %2259  ;;  %v1583_v62 = vmul.f32 %v2258_v26, %v2837_v36 }
 0x4a5   : > { %v2262_v61 = vpop.eup %2261  ;;  %v1586_v5 = vmul.f32 %v2260_v12, %v2840_v38  ;;  %1972 = vmatpush3.bf16.msra.mxu1 %v1594_v39 }
 0x4a6   : > { %v1584_v17 = vmul.f32 %v2262_v61, %v2843_v59  ;;  %1973 = vmatprep.subr.bf16.mxu1 %v2393_v34 }
 0x4a7   : > { %v1596_v15 = vpack.c.bf16 %v1586_v5, %v1585_v60 }
 0x4a8   : > { %v1595_v16 = vpack.c.bf16 %v1584_v17, %v1583_v62 }
 0x4aa   : > { %v2264_v63 = vpop.eup %2263  ;;  %1974 = vmatpush3.bf16.msra.mxu1 %v1595_v16 }
 0x4ab   : > { %v2266_v0 = vpop.eup %2265  ;;  %1975 = vmatprep.subr.bf16.mxu1 %v2393_v34  ;;  %v1589_v35 = vmul.f32 %v2264_v63, %v2846_v30 }
 0x4ac   : > { %v2268_v1 = vpop.eup %2267  ;;  %v1587_v7 = vmul.f32 %v2266_v0, %v2849_v2 }
 0x4ad   : > { %v2270_v20 = vpop.eup %2269  ;;  %v1590_v38 = vmul.f32 %v2268_v1, %v2852_v18 }
 0x4ae   : > { %v1588_v36 = vmul.f32 %v2270_v20, %v2855_v37  ;;  %1976 = vmatpush3.bf16.msra.mxu1 %v1596_v15 }
 0x4af   : > { %v1598_v59 = vpack.c.bf16 %v1590_v38, %v1589_v35  ;;  %1977 = vmatprep.subr.bf16.mxu1 %v2393_v34 }
 0x4b0   : > { %v1597_v23 = vpack.c.bf16 %v1588_v36, %v1587_v7 }
 0x4b2   : > { %1978 = vmatpush3.bf16.msra.mxu1 %v1597_v23 }
 0x4b3   : > { %1979 = vmatprep.subr.bf16.mxu1 %v2393_v34 }
 0x4b6   : > { %1980 = vmatpush3.bf16.msra.mxu1 %v1598_v59 }
 0x4b9   : > { %1982 = vmatmul.mubr.bf16.vlgmr.msra.gmra.mrb[0].mxu1 %v1599_v3 }
 0x58c   : > { %v1634_v30 = vpop.f32.mrb[0].mxu1 }
 0x58d   : > { %1640 = vst [vmem:[#allocation11] sm:$0xff] %v1634_v30  ;;  %v1983_v18 = vpop.f32.mrb[1].mxu1 }
 0x58e   : > { %v1637_v2 = vpop.f32.mrb[2].mxu1 }
 0x58f   : > { %v1984_v40 = vpop.f32.mrb[3].mxu1 }
 0x590 PF: > { %p2886_p9 = scmp.eq.s32.totalorder %s1719_s30, 2  ;;  %s2395_s18 = smov [#allocation11]  }
 0x591   : > { %s1648_s19 = sshll.u32 %s2395_s18, 4  ;;  %s1649_s19 = int_to_ptr.vmem [resolvable:$true] %s1648_s19 }
 0x592   : > { %s2327_s20 = scalar_lea.vmem %s1649_s19, 128  ;;  %p2334_p13 = scmp.lt.s32.totalorder %s1649_s19, %s1649_s19 }
 0x593   : > { %p2328_p10 = scmp.ne.s32.totalorder %s1649_s19, %s2327_s20  ;;  %p2335_p0 = scmp.lt.s32.totalorder %s2327_s20, %s2327_s20 }
 0x595   : > { %p2329_p11 = pnand %p2328_p10, %p2886_p9  ;;  %p2336_p1 = por %p2335_p0, %p2334_p13 }
 0x597   : > { %p2330_p12 = pneg %p2329_p11 }
 0x599   : > { %p2337_p2 = pnand %p2336_p1, %p2330_p12 }
 0x59b   : > { %2340 = shalt.err (!%p2337_p2)
}
 0x59c   : > { %s2341_s30 = scalar_lea.hbm %s2929_s8, 128 }
 0x59d   : > { %p2342_p5 = scmp.ne.s32.totalorder %s2929_s8, %s2341_s30  ;;  %p2347_p8 = scmp.lt.u32.totalorder %s2341_s30, %s2929_s8 }
 0x59f   : > { %p2343_p7 = pnand %p2342_p5, %p2886_p9 }
 0x5a1   : > { %p2344_p3 = pneg %p2343_p7 }
 0x5a3   : > { %p2349_p6 = pnand %p2347_p8, %p2344_p3 }
 0x5a5   : > { %2352 = shalt.err (!%p2349_p6)
}
 0x5a6   : > { %1998 = dma.vmem_to_hbm [thread:$0]  (%p2886_p9), %s1649_s19, 128, %s2929_s8, [#allocation8]  }
 0x5a7   : > { %2374 = dma.done.wait (%p2886_p9), [#allocation8], 128  }
 0x5a8   : > { %2376 = vsyncadd (%p2886_p9), [#allocation8], 4294967168 }
 0x5a9 PF: > { %s21_s29 = sadd.s32 1, %s2387_s29   ;;  %s2939_s27 = smov %s2383_s28 }
 0x5aa   : > { %p18_p4 = scmp.ge.s32.totalorder %s21_s29, 5   ;;  %s2940_s28 = smov %s2942_s9 }
 0x5ac   :  { %20 = sbr.rel (!%p18_p4) target bundleno = 4 (0x4), region = 109 }
 0x5b3   :  { %1661 = vsyncpa [#allocation7], 1 }
 0x5b4   :  { %1663 = vsyncpa [#allocation7 + $0x1], 1 }
 0x5b5   :  { %1664 = vsyncpa [#allocation10], 1 }
 0x5b6   :  { %1665 = vsyncpa [#allocation8], 1 }
 0x5b7   :  { %1667 = vsyncpa [#allocation8 + $0x1], 1 }

</bundles_post_ra>
